<compile_context>
chip_gen: v7x
topology: tpu7x:2x2x1
jax: 0.10.0
libtpu: 0.0.40
codegen_flags: <defaults>
</compile_context>

<pallas_src>
import numpy as np
import jax
import jax.numpy as jnp
from jax import lax
from jax.experimental import pallas as pl
from jax.experimental.pallas import tpu as pltpu


# ---------------------------------------------------------------------------
# Kernel helpers (traced Python; operands are scalars or (1, TB) f32 rows).
# ---------------------------------------------------------------------------
def _axangle_entries(x, y, z, c, s):
    """Rodrigues rotation matrix entries from an (already normalized) axis."""
    C = 1.0 - c
    xs, ys, zs = x * s, y * s, z * s
    xC, yC, zC = x * C, y * C, z * C
    xyC, yzC, zxC = x * yC, y * zC, z * xC
    return [[x * xC + c, xyC - zs, zxC + ys],
            [xyC + zs, y * yC + c, yzC - xs],
            [zxC - ys, yzC + xs, z * zC + c]]


def _mat3_mul(A, B):
    return [[sum(A[i][k] * B[k][j] for k in range(3)) for j in range(3)]
            for i in range(3)]


def _mat3_vec(A, v):
    return [sum(A[i][k] * v[k] for k in range(3)) for i in range(3)]


# ---------------------------------------------------------------------------
# The Pallas kernel.
# ---------------------------------------------------------------------------
def opensim_node_kernel(const_ref, mkr_ref, dyn_ref, out_ref):
    # const_ref : (33,)   f32 SMEM  packed constants, layout in _pack_constants()
    # mkr_ref   : (3*N,)  f32 SMEM  anchoredMarkers row-major (n, xyz)
    # dyn_ref   : (6, TB) f32 VMEM  rows: C1, C2, C3, ratio_x, ratio_y, ratio_z
    # out_ref   : (3+3N, TB) f32 VMEM  rows 0..2 joint xyz, row 3+3n+i marker n coord i
    c1 = dyn_ref[0:1, :]                        # (1, TB)
    c2 = dyn_ref[1:2, :]
    c3 = dyn_ref[2:3, :]
    ratio = [dyn_ref[3 + j:4 + j, :] for j in range(3)]

    def cst(k):                                 # scalar read from SMEM
        return const_ref[k]

    a1 = [cst(0), cst(1), cst(2)]               # rot1 axis (pre-normalized, host-side)
    a2 = [cst(3), cst(4), cst(5)]               # rot2 axis
    a3 = [cst(6), cst(7), cst(8)]               # rot3 axis
    P = [[cst(9 + 3 * i + j) for j in range(3)] for i in range(3)]    # parent rot
    CmT = [[cst(18 + 3 * i + j) for j in range(3)] for i in range(3)]  # child rot^T
    ploc = [cst(27 + i) for i in range(3)]      # parentLoc
    cloc = [cst(30 + j) for j in range(3)]      # childLoc

    # --- R1 = axangle2mat(rot1Axis, C1)  (scalar axis, vector angle) --------
    R1 = _axangle_entries(a1[0], a1[1], a1[2], jnp.cos(c1), jnp.sin(c1))

    # --- R2 = axangle2mat(normalize(R1 @ rot2Axis), C2) ---------------------
    t2 = _mat3_vec(R1, a2)                                             # (1,TB)
    inv2 = lax.rsqrt(t2[0] * t2[0] + t2[1] * t2[1] + t2[2] * t2[2])
    t2 = [v * inv2 for v in t2]
    R2 = _axangle_entries(t2[0], t2[1], t2[2], jnp.cos(c2), jnp.sin(c2))

    # --- R3 = axangle2mat(normalize(R2 @ (R1 @ rot3Axis)), C3) --------------
    t3 = _mat3_vec(R2, _mat3_vec(R1, a3))
    inv3 = lax.rsqrt(t3[0] * t3[0] + t3[1] * t3[1] + t3[2] * t3[2])
    t3 = [v * inv3 for v in t3]
    R3 = _axangle_entries(t3[0], t3[1], t3[2], jnp.cos(c3), jnp.sin(c3))

    # --- X = R3 @ R2 @ R1 ----------------------------------------------------
    X = _mat3_mul(R3, _mat3_mul(R2, R1))

    # transformInGround = parentFrame @ homog(X) @ inv(childFrame):
    #   Rg = P @ X @ Cm^T,  t = parentLoc - Rg @ (ratio * childLoc)
    Rg = _mat3_mul(P, _mat3_mul(X, CmT))

    cl = [ratio[j] * cloc[j] for j in range(3)]                        # (1,TB)
    Rg_cl = _mat3_vec(Rg, cl)
    t = [ploc[i] - Rg_cl[i] for i in range(3)]

    # Joint position (child=True, parent=None): Rg@cl + t  (== parentLoc algebraically)
    for i in range(3):
        out_ref[i:i + 1, :] = Rg_cl[i] + t[i]

    # Marker positions: Rg @ (anchoredMarkers * bodyShapeRatio) + t
    n_markers = mkr_ref.shape[0] // 3
    for n in range(n_markers):
        mloc = [mkr_ref[3 * n + j] * ratio[j] for j in range(3)]       # (1,TB)
        for i in range(3):
            out_ref[3 + 3 * n + i:4 + 3 * n + i, :] = (
                Rg[i][0] * mloc[0] + Rg[i][1] * mloc[1]
                + Rg[i][2] * mloc[2] + t[i])


# ---------------------------------------------------------------------------
# Wrapper / parameter setup (plain JAX glue).
# ---------------------------------------------------------------------------
def euler2mat_np(x, y, z):
    rx = np.array([[1, 0, 0, 0],
                   [0, np.cos(x), -np.sin(x), 0],
                   [0, np.sin(x), np.cos(x), 0],
                   [0, 0, 0, 1]])
    ry = np.array([[np.cos(y), 0, np.sin(y), 0],
                   [0, 1, 0, 0],
                   [-np.sin(y), 0, np.cos(y), 0],
                   [0, 0, 0, 1]])
    rz = np.array([[np.cos(z), -np.sin(z), 0, 0],
                   [np.sin(z), np.cos(z), 0, 0],
                   [0, 0, 1, 0],
                   [0, 0, 0, 1]])
    return rx.dot(ry.dot(rz))


def make_params():
    parentOrient = np.array([0.10, 0.20, 0.30], np.float32)
    childOrient = np.array([-0.20, 0.10, 0.05], np.float32)
    parentLoc = np.array([0.01, 0.02, 0.03], np.float32)
    childLoc = np.array([0.05, -0.04, 0.10], np.float32)
    rot1Axis = np.array([1.0, 0.0, 0.0], np.float32)
    rot2Axis = np.array([0.0, 1.0, 0.0], np.float32)
    rot3Axis = np.array([0.0, 0.0, 1.0], np.float32)
    anchoredMarkers = np.array([[0.02, 0.03, -0.01],
                                [-0.05, 0.01, 0.04],
                                [0.10, -0.02, 0.00],
                                [0.00, 0.06, -0.03]], np.float32)  # N=4 markers
    originalparentMat = euler2mat_np(*parentOrient).astype(np.float32)
    originalchildMat = euler2mat_np(*childOrient).astype(np.float32)
    return dict(parentOrient=parentOrient, childOrient=childOrient,
                parentLoc=parentLoc, childLoc=childLoc,
                rot1Axis=rot1Axis, rot2Axis=rot2Axis, rot3Axis=rot3Axis,
                anchoredMarkers=anchoredMarkers,
                originalparentMat=originalparentMat,
                originalchildMat=originalchildMat)


def _pack_constants(params):
    """Pack all batch-independent constants into one 1-D f32 slab (SMEM)."""
    r1 = np.asarray(params["rot1Axis"], np.float64)
    r1 = r1 / (np.linalg.norm(r1) + 1e-15)   # fold rot1 normalization out of the kernel
    P = np.asarray(params["originalparentMat"], np.float64)[:3, :3]
    CmT = np.asarray(params["originalchildMat"], np.float64)[:3, :3].T
    return np.concatenate([
        r1,                                                    # [0:3]
        np.asarray(params["rot2Axis"], np.float64),            # [3:6]
        np.asarray(params["rot3Axis"], np.float64),            # [6:9]
        P.reshape(-1),                                         # [9:18]
        CmT.reshape(-1),                                       # [18:27]
        np.asarray(params["parentLoc"], np.float64),           # [27:30]
        np.asarray(params["childLoc"], np.float64),            # [30:33]
    ]).astype(np.float32)


def opensim_node_forward(params, C1, C2, C3, bodyShapeRatio, parentBodyShapeRatio):
    """Returns (jointPos (B,1,3), markerPos (B,N,3)).  parentBodyShapeRatio is
    unused because this node has parent=None (exactly like the PyTorch module)."""
    del parentBodyShapeRatio
    f32 = jnp.float32
    B = bodyShapeRatio.shape[0]
    N = params["anchoredMarkers"].shape[0]
    NROWS = 3 + 3 * N

    LANE = 128
    TB = min(512, ((B + LANE - 1) // LANE) * LANE)   # batch tile (multiple of 128 lanes)
    Bp = ((B + TB - 1) // TB) * TB                   # padded batch (zero-pad is NaN-safe)

    # Dynamic per-batch inputs, batch on the lane axis: (6, Bp).
    dyn = jnp.concatenate([
        C1.astype(f32).reshape(B, 1).T,
        C2.astype(f32).reshape(B, 1).T,
        C3.astype(f32).reshape(B, 1).T,
        bodyShapeRatio.astype(f32).T,
    ], axis=0)
    dyn = jnp.pad(dyn, ((0, 0), (0, Bp - B)))

    const = jnp.asarray(_pack_constants(params), f32)                 # (33,)
    mkr = jnp.asarray(params["anchoredMarkers"], f32).reshape(-1)     # (3N,)

    smem = pl.BlockSpec(memory_space=pltpu.MemorySpace.SMEM)
    out = pl.pallas_call(
        opensim_node_kernel,
        out_shape=jax.ShapeDtypeStruct((NROWS, Bp), f32),
        grid=(Bp // TB,),
        in_specs=[smem, smem,
                  pl.BlockSpec((6, TB), lambda b: (0, b))],
        out_specs=pl.BlockSpec((NROWS, TB), lambda b: (0, b)),
        compiler_params=pltpu.CompilerParams(
            dimension_semantics=("parallel",)),
    )(const, mkr, dyn)

    # Kernel output is lane-dense (rows, B).  Downstream consumers should prefer
    # this layout directly; the reshape/transpose below only restores the
    # PyTorch (B,1,3)/(B,N,3) layout for API compatibility.
    jointPos = out[0:3, :B].T.reshape(B, 1, 3)
    markerPos = jnp.transpose(out[3:, :B].reshape(N, 3, B), (2, 0, 1))
    return jointPos, markerPos


# ---------------------------------------------------------------------------
# Pure-numpy reference that mirrors the PyTorch forward (batched, non-root).
# ---------------------------------------------------------------------------
def reference_forward(pm, C1, C2, C3, ratio):
    B = ratio.shape[0]
    parentFrame = np.tile(pm["originalparentMat"].astype(np.float64)[None], (B, 1, 1))
    childFrame = np.tile(pm["originalchildMat"].astype(np.float64)[None], (B, 1, 1))
    parentFrame[:, :3, 3] = pm["parentLoc"]            # parent is None
    childFrame[:, :3, 3] = ratio * pm["childLoc"]
    childFrameInv = np.linalg.inv(childFrame)

    def axangle(axis, angle):
        axis = axis / (np.linalg.norm(axis, axis=-1, keepdims=True) + 1e-15)
        x, y, z = axis[:, 0], axis[:, 1], axis[:, 2]
        c, s = np.cos(angle[:, 0]), np.sin(angle[:, 0])
        C = 1 - c
        xs, ys, zs = x * s, y * s, z * s
        xC, yC, zC = x * C, y * C, z * C
        xyC, yzC, zxC = x * yC, y * zC, z * xC
        R = np.empty((axis.shape[0], 3, 3))
        R[:, 0, 0] = x * xC + c; R[:, 0, 1] = xyC - zs; R[:, 0, 2] = zxC + ys
        R[:, 1, 0] = xyC + zs; R[:, 1, 1] = y * yC + c; R[:, 1, 2] = yzC - xs
        R[:, 2, 0] = zxC - ys; R[:, 2, 1] = yzC + xs; R[:, 2, 2] = z * zC + c
        return R

    R1 = axangle(np.tile(pm["rot1Axis"].astype(np.float64)[None], (B, 1)), C1)
    temp = np.einsum('bij,j->bi', R1, pm["rot2Axis"].astype(np.float64))
    R2 = axangle(temp, C2)
    temp = np.einsum('bij,j->bi', R1, pm["rot3Axis"].astype(np.float64))
    temp = np.einsum('bij,bj->bi', R2, temp)
    R3 = axangle(temp, C3)
    X = np.einsum('bij,bjk->bik', R3, np.einsum('bij,bjk->bik', R2, R1))
    Rh = np.zeros((B, 4, 4)); Rh[:, :3, :3] = X; Rh[:, 3, 3] = 1.0
    TIG = np.einsum('bij,bjk->bik', parentFrame,
                    np.einsum('bij,bjk->bik', Rh, childFrameInv))
    joint = np.einsum('bij,bj->bi', TIG,
                      np.linalg.inv(childFrameInv)[:, :, -1])[:, :3].reshape(B, 1, 3)
    markers = pm["anchoredMarkers"].astype(np.float64)
    markerLoc = np.einsum('nj,bj->bnj', markers, ratio)
    markerPos = (np.einsum('bij,bnj->bni', TIG[:, :3, :3], markerLoc)
                 + TIG[:, :3, 3][:, None, :])
    return joint, markerPos


if __name__ == "__main__":
    B = 8
    params = make_params()

    key = jax.random.PRNGKey(0)
    k1, k2, k3, k4, k5 = jax.random.split(key, 5)
    C1 = jax.random.uniform(k1, (B, 1), jnp.float32, -1.0, 1.0)
    C2 = jax.random.uniform(k2, (B, 1), jnp.float32, -1.0, 1.0)
    C3 = jax.random.uniform(k3, (B, 1), jnp.float32, -1.0, 1.0)
    bodyShapeRatio = 1.0 + 0.2 * jax.random.uniform(k4, (B, 3), jnp.float32, -1.0, 1.0)
    parentBodyShapeRatio = 1.0 + 0.2 * jax.random.uniform(k5, (B, 3), jnp.float32,
                                                          -1.0, 1.0)

    fwd = jax.jit(lambda a, b, c, r, pr:
                  opensim_node_forward(params, a, b, c, r, pr))
    jointPos, markerPos = fwd(C1, C2, C3, bodyShapeRatio, parentBodyShapeRatio)
    jointPos = jax.block_until_ready(jointPos)
    markerPos = jax.block_until_ready(markerPos)

    joint_ref, marker_ref = reference_forward(
        params, np.asarray(C1, np.float64), np.asarray(C2, np.float64),
        np.asarray(C3, np.float64), np.asarray(bodyShapeRatio, np.float64))

    np.testing.assert_allclose(np.asarray(jointPos), joint_ref, rtol=1e-4, atol=1e-5)
    np.testing.assert_allclose(np.asarray(markerPos), marker_ref, rtol=1e-4, atol=1e-5)

    print("KERNEL_OK")
</pallas_src>

<mosaic_0001>
module attributes {stable_mosaic.version = 11 : i64} {
  func.func @opensim_node_kernel(%arg0: i32, %arg1: memref<33xf32, #tpu.memory_space<smem>>, %arg2: memref<12xf32, #tpu.memory_space<smem>>, %arg3: memref<6x128xf32, #tpu.memory_space<vmem>>, %arg4: memref<15x128xf32, #tpu.memory_space<vmem>>) attributes {dimension_semantics = [#tpu.dimension_semantics<parallel>], iteration_bounds = array<i64: 1>, scalar_prefetch = 0 : i64, scratch_operands = 0 : i64, tpu.core_type = #tpu.core_type<tc>, window_params = [{transform_indices = @transform_0, window_bounds = array<i64: 33>}, {transform_indices = @transform_1, window_bounds = array<i64: 12>}, {transform_indices = @transform_2, window_bounds = array<i64: 6, 128>}, {transform_indices = @transform_3, window_bounds = array<i64: 15, 128>}]} {
    %c0 = arith.constant 0 : index
    %c0_0 = arith.constant 0 : index
    %0 = vector.load %arg3[%c0, %c0_0] : memref<6x128xf32, #tpu.memory_space<vmem>>, vector<1x128xf32>
    %c1 = arith.constant 1 : index
    %c0_1 = arith.constant 0 : index
    %1 = vector.load %arg3[%c1, %c0_1] : memref<6x128xf32, #tpu.memory_space<vmem>>, vector<1x128xf32>
    %c2 = arith.constant 2 : index
    %c0_2 = arith.constant 0 : index
    %2 = vector.load %arg3[%c2, %c0_2] : memref<6x128xf32, #tpu.memory_space<vmem>>, vector<1x128xf32>
    %c3 = arith.constant 3 : index
    %c0_3 = arith.constant 0 : index
    %3 = vector.load %arg3[%c3, %c0_3] : memref<6x128xf32, #tpu.memory_space<vmem>>, vector<1x128xf32>
    %c4 = arith.constant 4 : index
    %c0_4 = arith.constant 0 : index
    %4 = vector.load %arg3[%c4, %c0_4] : memref<6x128xf32, #tpu.memory_space<vmem>>, vector<1x128xf32>
    %c5 = arith.constant 5 : index
    %c0_5 = arith.constant 0 : index
    %5 = vector.load %arg3[%c5, %c0_5] : memref<6x128xf32, #tpu.memory_space<vmem>>, vector<1x128xf32>
    %c0_6 = arith.constant 0 : index
    %6 = memref.load %arg1[%c0_6] : memref<33xf32, #tpu.memory_space<smem>>
    %c1_7 = arith.constant 1 : index
    %7 = memref.load %arg1[%c1_7] : memref<33xf32, #tpu.memory_space<smem>>
    %c2_8 = arith.constant 2 : index
    %8 = memref.load %arg1[%c2_8] : memref<33xf32, #tpu.memory_space<smem>>
    %c3_9 = arith.constant 3 : index
    %9 = memref.load %arg1[%c3_9] : memref<33xf32, #tpu.memory_space<smem>>
    %c4_10 = arith.constant 4 : index
    %10 = memref.load %arg1[%c4_10] : memref<33xf32, #tpu.memory_space<smem>>
    %c5_11 = arith.constant 5 : index
    %11 = memref.load %arg1[%c5_11] : memref<33xf32, #tpu.memory_space<smem>>
    %c6 = arith.constant 6 : index
    %12 = memref.load %arg1[%c6] : memref<33xf32, #tpu.memory_space<smem>>
    %c7 = arith.constant 7 : index
    %13 = memref.load %arg1[%c7] : memref<33xf32, #tpu.memory_space<smem>>
    %c8 = arith.constant 8 : index
    %14 = memref.load %arg1[%c8] : memref<33xf32, #tpu.memory_space<smem>>
    %c9 = arith.constant 9 : index
    %15 = memref.load %arg1[%c9] : memref<33xf32, #tpu.memory_space<smem>>
    %c10 = arith.constant 10 : index
    %16 = memref.load %arg1[%c10] : memref<33xf32, #tpu.memory_space<smem>>
    %c11 = arith.constant 11 : index
    %17 = memref.load %arg1[%c11] : memref<33xf32, #tpu.memory_space<smem>>
    %c12 = arith.constant 12 : index
    %18 = memref.load %arg1[%c12] : memref<33xf32, #tpu.memory_space<smem>>
    %c13 = arith.constant 13 : index
    %19 = memref.load %arg1[%c13] : memref<33xf32, #tpu.memory_space<smem>>
    %c14 = arith.constant 14 : index
    %20 = memref.load %arg1[%c14] : memref<33xf32, #tpu.memory_space<smem>>
    %c15 = arith.constant 15 : index
    %21 = memref.load %arg1[%c15] : memref<33xf32, #tpu.memory_space<smem>>
    %c16 = arith.constant 16 : index
    %22 = memref.load %arg1[%c16] : memref<33xf32, #tpu.memory_space<smem>>
    %c17 = arith.constant 17 : index
    %23 = memref.load %arg1[%c17] : memref<33xf32, #tpu.memory_space<smem>>
    %c18 = arith.constant 18 : index
    %24 = memref.load %arg1[%c18] : memref<33xf32, #tpu.memory_space<smem>>
    %c19 = arith.constant 19 : index
    %25 = memref.load %arg1[%c19] : memref<33xf32, #tpu.memory_space<smem>>
    %c20 = arith.constant 20 : index
    %26 = memref.load %arg1[%c20] : memref<33xf32, #tpu.memory_space<smem>>
    %c21 = arith.constant 21 : index
    %27 = memref.load %arg1[%c21] : memref<33xf32, #tpu.memory_space<smem>>
    %c22 = arith.constant 22 : index
    %28 = memref.load %arg1[%c22] : memref<33xf32, #tpu.memory_space<smem>>
    %c23 = arith.constant 23 : index
    %29 = memref.load %arg1[%c23] : memref<33xf32, #tpu.memory_space<smem>>
    %c24 = arith.constant 24 : index
    %30 = memref.load %arg1[%c24] : memref<33xf32, #tpu.memory_space<smem>>
    %c25 = arith.constant 25 : index
    %31 = memref.load %arg1[%c25] : memref<33xf32, #tpu.memory_space<smem>>
    %c26 = arith.constant 26 : index
    %32 = memref.load %arg1[%c26] : memref<33xf32, #tpu.memory_space<smem>>
    %c27 = arith.constant 27 : index
    %33 = memref.load %arg1[%c27] : memref<33xf32, #tpu.memory_space<smem>>
    %c28 = arith.constant 28 : index
    %34 = memref.load %arg1[%c28] : memref<33xf32, #tpu.memory_space<smem>>
    %c29 = arith.constant 29 : index
    %35 = memref.load %arg1[%c29] : memref<33xf32, #tpu.memory_space<smem>>
    %c30 = arith.constant 30 : index
    %36 = memref.load %arg1[%c30] : memref<33xf32, #tpu.memory_space<smem>>
    %c31 = arith.constant 31 : index
    %37 = memref.load %arg1[%c31] : memref<33xf32, #tpu.memory_space<smem>>
    %c32 = arith.constant 32 : index
    %38 = memref.load %arg1[%c32] : memref<33xf32, #tpu.memory_space<smem>>
    %39 = math.cos %0 : vector<1x128xf32>
    %40 = math.sin %0 : vector<1x128xf32>
    %cst = arith.constant 1.000000e+00 : f32
    %41 = vector.broadcast %cst : f32 to vector<1x128xf32>
    %42 = arith.subf %41, %39 : vector<1x128xf32>
    %43 = vector.broadcast %6 : f32 to vector<1x128xf32>
    %44 = arith.mulf %43, %40 : vector<1x128xf32>
    %45 = vector.broadcast %7 : f32 to vector<1x128xf32>
    %46 = arith.mulf %45, %40 : vector<1x128xf32>
    %47 = vector.broadcast %8 : f32 to vector<1x128xf32>
    %48 = arith.mulf %47, %40 : vector<1x128xf32>
    %49 = vector.broadcast %6 : f32 to vector<1x128xf32>
    %50 = arith.mulf %49, %42 : vector<1x128xf32>
    %51 = vector.broadcast %7 : f32 to vector<1x128xf32>
    %52 = arith.mulf %51, %42 : vector<1x128xf32>
    %53 = vector.broadcast %8 : f32 to vector<1x128xf32>
    %54 = arith.mulf %53, %42 : vector<1x128xf32>
    %55 = vector.broadcast %6 : f32 to vector<1x128xf32>
    %56 = arith.mulf %55, %52 : vector<1x128xf32>
    %57 = vector.broadcast %7 : f32 to vector<1x128xf32>
    %58 = arith.mulf %57, %54 : vector<1x128xf32>
    %59 = vector.broadcast %8 : f32 to vector<1x128xf32>
    %60 = arith.mulf %59, %50 : vector<1x128xf32>
    %61 = vector.broadcast %6 : f32 to vector<1x128xf32>
    %62 = arith.mulf %61, %50 : vector<1x128xf32>
    %63 = arith.addf %62, %39 : vector<1x128xf32>
    %64 = arith.subf %56, %48 : vector<1x128xf32>
    %65 = arith.addf %60, %46 : vector<1x128xf32>
    %66 = arith.addf %56, %48 : vector<1x128xf32>
    %67 = vector.broadcast %7 : f32 to vector<1x128xf32>
    %68 = arith.mulf %67, %52 : vector<1x128xf32>
    %69 = arith.addf %68, %39 : vector<1x128xf32>
    %70 = arith.subf %58, %44 : vector<1x128xf32>
    %71 = arith.subf %60, %46 : vector<1x128xf32>
    %72 = arith.addf %58, %44 : vector<1x128xf32>
    %73 = vector.broadcast %8 : f32 to vector<1x128xf32>
    %74 = arith.mulf %73, %54 : vector<1x128xf32>
    %75 = arith.addf %74, %39 : vector<1x128xf32>
    %76 = vector.broadcast %9 : f32 to vector<1x128xf32>
    %77 = arith.mulf %63, %76 : vector<1x128xf32>
    %cst_12 = arith.constant 0.000000e+00 : f32
    %78 = vector.broadcast %cst_12 : f32 to vector<1x128xf32>
    %79 = arith.addf %78, %77 : vector<1x128xf32>
    %80 = vector.broadcast %10 : f32 to vector<1x128xf32>
    %81 = arith.mulf %64, %80 : vector<1x128xf32>
    %82 = arith.addf %79, %81 : vector<1x128xf32>
    %83 = vector.broadcast %11 : f32 to vector<1x128xf32>
    %84 = arith.mulf %65, %83 : vector<1x128xf32>
    %85 = arith.addf %82, %84 : vector<1x128xf32>
    %86 = vector.broadcast %9 : f32 to vector<1x128xf32>
    %87 = arith.mulf %66, %86 : vector<1x128xf32>
    %cst_13 = arith.constant 0.000000e+00 : f32
    %88 = vector.broadcast %cst_13 : f32 to vector<1x128xf32>
    %89 = arith.addf %88, %87 : vector<1x128xf32>
    %90 = vector.broadcast %10 : f32 to vector<1x128xf32>
    %91 = arith.mulf %69, %90 : vector<1x128xf32>
    %92 = arith.addf %89, %91 : vector<1x128xf32>
    %93 = vector.broadcast %11 : f32 to vector<1x128xf32>
    %94 = arith.mulf %70, %93 : vector<1x128xf32>
    %95 = arith.addf %92, %94 : vector<1x128xf32>
    %96 = vector.broadcast %9 : f32 to vector<1x128xf32>
    %97 = arith.mulf %71, %96 : vector<1x128xf32>
    %cst_14 = arith.constant 0.000000e+00 : f32
    %98 = vector.broadcast %cst_14 : f32 to vector<1x128xf32>
    %99 = arith.addf %98, %97 : vector<1x128xf32>
    %100 = vector.broadcast %10 : f32 to vector<1x128xf32>
    %101 = arith.mulf %72, %100 : vector<1x128xf32>
    %102 = arith.addf %99, %101 : vector<1x128xf32>
    %103 = vector.broadcast %11 : f32 to vector<1x128xf32>
    %104 = arith.mulf %75, %103 : vector<1x128xf32>
    %105 = arith.addf %102, %104 : vector<1x128xf32>
    %106 = arith.mulf %85, %85 : vector<1x128xf32>
    %107 = arith.mulf %95, %95 : vector<1x128xf32>
    %108 = arith.addf %106, %107 : vector<1x128xf32>
    %109 = arith.mulf %105, %105 : vector<1x128xf32>
    %110 = arith.addf %108, %109 : vector<1x128xf32>
    %111 = math.rsqrt %110 : vector<1x128xf32>
    %112 = arith.mulf %85, %111 : vector<1x128xf32>
    %113 = arith.mulf %95, %111 : vector<1x128xf32>
    %114 = arith.mulf %105, %111 : vector<1x128xf32>
    %115 = math.cos %1 : vector<1x128xf32>
    %116 = math.sin %1 : vector<1x128xf32>
    %cst_15 = arith.constant 1.000000e+00 : f32
    %117 = vector.broadcast %cst_15 : f32 to vector<1x128xf32>
    %118 = arith.subf %117, %115 : vector<1x128xf32>
    %119 = arith.mulf %112, %116 : vector<1x128xf32>
    %120 = arith.mulf %113, %116 : vector<1x128xf32>
    %121 = arith.mulf %114, %116 : vector<1x128xf32>
    %122 = arith.mulf %112, %118 : vector<1x128xf32>
    %123 = arith.mulf %113, %118 : vector<1x128xf32>
    %124 = arith.mulf %114, %118 : vector<1x128xf32>
    %125 = arith.mulf %112, %123 : vector<1x128xf32>
    %126 = arith.mulf %113, %124 : vector<1x128xf32>
    %127 = arith.mulf %114, %122 : vector<1x128xf32>
    %128 = arith.mulf %112, %122 : vector<1x128xf32>
    %129 = arith.addf %128, %115 : vector<1x128xf32>
    %130 = arith.subf %125, %121 : vector<1x128xf32>
    %131 = arith.addf %127, %120 : vector<1x128xf32>
    %132 = arith.addf %125, %121 : vector<1x128xf32>
    %133 = arith.mulf %113, %123 : vector<1x128xf32>
    %134 = arith.addf %133, %115 : vector<1x128xf32>
    %135 = arith.subf %126, %119 : vector<1x128xf32>
    %136 = arith.subf %127, %120 : vector<1x128xf32>
    %137 = arith.addf %126, %119 : vector<1x128xf32>
    %138 = arith.mulf %114, %124 : vector<1x128xf32>
    %139 = arith.addf %138, %115 : vector<1x128xf32>
    %140 = vector.broadcast %12 : f32 to vector<1x128xf32>
    %141 = arith.mulf %63, %140 : vector<1x128xf32>
    %cst_16 = arith.constant 0.000000e+00 : f32
    %142 = vector.broadcast %cst_16 : f32 to vector<1x128xf32>
    %143 = arith.addf %142, %141 : vector<1x128xf32>
    %144 = vector.broadcast %13 : f32 to vector<1x128xf32>
    %145 = arith.mulf %64, %144 : vector<1x128xf32>
    %146 = arith.addf %143, %145 : vector<1x128xf32>
    %147 = vector.broadcast %14 : f32 to vector<1x128xf32>
    %148 = arith.mulf %65, %147 : vector<1x128xf32>
    %149 = arith.addf %146, %148 : vector<1x128xf32>
    %150 = vector.broadcast %12 : f32 to vector<1x128xf32>
    %151 = arith.mulf %66, %150 : vector<1x128xf32>
    %cst_17 = arith.constant 0.000000e+00 : f32
    %152 = vector.broadcast %cst_17 : f32 to vector<1x128xf32>
    %153 = arith.addf %152, %151 : vector<1x128xf32>
    %154 = vector.broadcast %13 : f32 to vector<1x128xf32>
    %155 = arith.mulf %69, %154 : vector<1x128xf32>
    %156 = arith.addf %153, %155 : vector<1x128xf32>
    %157 = vector.broadcast %14 : f32 to vector<1x128xf32>
    %158 = arith.mulf %70, %157 : vector<1x128xf32>
    %159 = arith.addf %156, %158 : vector<1x128xf32>
    %160 = vector.broadcast %12 : f32 to vector<1x128xf32>
    %161 = arith.mulf %71, %160 : vector<1x128xf32>
    %cst_18 = arith.constant 0.000000e+00 : f32
    %162 = vector.broadcast %cst_18 : f32 to vector<1x128xf32>
    %163 = arith.addf %162, %161 : vector<1x128xf32>
    %164 = vector.broadcast %13 : f32 to vector<1x128xf32>
    %165 = arith.mulf %72, %164 : vector<1x128xf32>
    %166 = arith.addf %163, %165 : vector<1x128xf32>
    %167 = vector.broadcast %14 : f32 to vector<1x128xf32>
    %168 = arith.mulf %75, %167 : vector<1x128xf32>
    %169 = arith.addf %166, %168 : vector<1x128xf32>
    %170 = arith.mulf %129, %149 : vector<1x128xf32>
    %cst_19 = arith.constant 0.000000e+00 : f32
    %171 = vector.broadcast %cst_19 : f32 to vector<1x128xf32>
    %172 = arith.addf %171, %170 : vector<1x128xf32>
    %173 = arith.mulf %130, %159 : vector<1x128xf32>
    %174 = arith.addf %172, %173 : vector<1x128xf32>
    %175 = arith.mulf %131, %169 : vector<1x128xf32>
    %176 = arith.addf %174, %175 : vector<1x128xf32>
    %177 = arith.mulf %132, %149 : vector<1x128xf32>
    %cst_20 = arith.constant 0.000000e+00 : f32
    %178 = vector.broadcast %cst_20 : f32 to vector<1x128xf32>
    %179 = arith.addf %178, %177 : vector<1x128xf32>
    %180 = arith.mulf %134, %159 : vector<1x128xf32>
    %181 = arith.addf %179, %180 : vector<1x128xf32>
    %182 = arith.mulf %135, %169 : vector<1x128xf32>
    %183 = arith.addf %181, %182 : vector<1x128xf32>
    %184 = arith.mulf %136, %149 : vector<1x128xf32>
    %cst_21 = arith.constant 0.000000e+00 : f32
    %185 = vector.broadcast %cst_21 : f32 to vector<1x128xf32>
    %186 = arith.addf %185, %184 : vector<1x128xf32>
    %187 = arith.mulf %137, %159 : vector<1x128xf32>
    %188 = arith.addf %186, %187 : vector<1x128xf32>
    %189 = arith.mulf %139, %169 : vector<1x128xf32>
    %190 = arith.addf %188, %189 : vector<1x128xf32>
    %191 = arith.mulf %176, %176 : vector<1x128xf32>
    %192 = arith.mulf %183, %183 : vector<1x128xf32>
    %193 = arith.addf %191, %192 : vector<1x128xf32>
    %194 = arith.mulf %190, %190 : vector<1x128xf32>
    %195 = arith.addf %193, %194 : vector<1x128xf32>
    %196 = math.rsqrt %195 : vector<1x128xf32>
    %197 = arith.mulf %176, %196 : vector<1x128xf32>
    %198 = arith.mulf %183, %196 : vector<1x128xf32>
    %199 = arith.mulf %190, %196 : vector<1x128xf32>
    %200 = math.cos %2 : vector<1x128xf32>
    %201 = math.sin %2 : vector<1x128xf32>
    %cst_22 = arith.constant 1.000000e+00 : f32
    %202 = vector.broadcast %cst_22 : f32 to vector<1x128xf32>
    %203 = arith.subf %202, %200 : vector<1x128xf32>
    %204 = arith.mulf %197, %201 : vector<1x128xf32>
    %205 = arith.mulf %198, %201 : vector<1x128xf32>
    %206 = arith.mulf %199, %201 : vector<1x128xf32>
    %207 = arith.mulf %197, %203 : vector<1x128xf32>
    %208 = arith.mulf %198, %203 : vector<1x128xf32>
    %209 = arith.mulf %199, %203 : vector<1x128xf32>
    %210 = arith.mulf %197, %208 : vector<1x128xf32>
    %211 = arith.mulf %198, %209 : vector<1x128xf32>
    %212 = arith.mulf %199, %207 : vector<1x128xf32>
    %213 = arith.mulf %197, %207 : vector<1x128xf32>
    %214 = arith.addf %213, %200 : vector<1x128xf32>
    %215 = arith.subf %210, %206 : vector<1x128xf32>
    %216 = arith.addf %212, %205 : vector<1x128xf32>
    %217 = arith.addf %210, %206 : vector<1x128xf32>
    %218 = arith.mulf %198, %208 : vector<1x128xf32>
    %219 = arith.addf %218, %200 : vector<1x128xf32>
    %220 = arith.subf %211, %204 : vector<1x128xf32>
    %221 = arith.subf %212, %205 : vector<1x128xf32>
    %222 = arith.addf %211, %204 : vector<1x128xf32>
    %223 = arith.mulf %199, %209 : vector<1x128xf32>
    %224 = arith.addf %223, %200 : vector<1x128xf32>
    %225 = arith.mulf %129, %63 : vector<1x128xf32>
    %cst_23 = arith.constant 0.000000e+00 : f32
    %226 = vector.broadcast %cst_23 : f32 to vector<1x128xf32>
    %227 = arith.addf %226, %225 : vector<1x128xf32>
    %228 = arith.mulf %130, %66 : vector<1x128xf32>
    %229 = arith.addf %227, %228 : vector<1x128xf32>
    %230 = arith.mulf %131, %71 : vector<1x128xf32>
    %231 = arith.addf %229, %230 : vector<1x128xf32>
    %232 = arith.mulf %129, %64 : vector<1x128xf32>
    %cst_24 = arith.constant 0.000000e+00 : f32
    %233 = vector.broadcast %cst_24 : f32 to vector<1x128xf32>
    %234 = arith.addf %233, %232 : vector<1x128xf32>
    %235 = arith.mulf %130, %69 : vector<1x128xf32>
    %236 = arith.addf %234, %235 : vector<1x128xf32>
    %237 = arith.mulf %131, %72 : vector<1x128xf32>
    %238 = arith.addf %236, %237 : vector<1x128xf32>
    %239 = arith.mulf %129, %65 : vector<1x128xf32>
    %cst_25 = arith.constant 0.000000e+00 : f32
    %240 = vector.broadcast %cst_25 : f32 to vector<1x128xf32>
    %241 = arith.addf %240, %239 : vector<1x128xf32>
    %242 = arith.mulf %130, %70 : vector<1x128xf32>
    %243 = arith.addf %241, %242 : vector<1x128xf32>
    %244 = arith.mulf %131, %75 : vector<1x128xf32>
    %245 = arith.addf %243, %244 : vector<1x128xf32>
    %246 = arith.mulf %132, %63 : vector<1x128xf32>
    %cst_26 = arith.constant 0.000000e+00 : f32
    %247 = vector.broadcast %cst_26 : f32 to vector<1x128xf32>
    %248 = arith.addf %247, %246 : vector<1x128xf32>
    %249 = arith.mulf %134, %66 : vector<1x128xf32>
    %250 = arith.addf %248, %249 : vector<1x128xf32>
    %251 = arith.mulf %135, %71 : vector<1x128xf32>
    %252 = arith.addf %250, %251 : vector<1x128xf32>
    %253 = arith.mulf %132, %64 : vector<1x128xf32>
    %cst_27 = arith.constant 0.000000e+00 : f32
    %254 = vector.broadcast %cst_27 : f32 to vector<1x128xf32>
    %255 = arith.addf %254, %253 : vector<1x128xf32>
    %256 = arith.mulf %134, %69 : vector<1x128xf32>
    %257 = arith.addf %255, %256 : vector<1x128xf32>
    %258 = arith.mulf %135, %72 : vector<1x128xf32>
    %259 = arith.addf %257, %258 : vector<1x128xf32>
    %260 = arith.mulf %132, %65 : vector<1x128xf32>
    %cst_28 = arith.constant 0.000000e+00 : f32
    %261 = vector.broadcast %cst_28 : f32 to vector<1x128xf32>
    %262 = arith.addf %261, %260 : vector<1x128xf32>
    %263 = arith.mulf %134, %70 : vector<1x128xf32>
    %264 = arith.addf %262, %263 : vector<1x128xf32>
    %265 = arith.mulf %135, %75 : vector<1x128xf32>
    %266 = arith.addf %264, %265 : vector<1x128xf32>
    %267 = arith.mulf %136, %63 : vector<1x128xf32>
    %cst_29 = arith.constant 0.000000e+00 : f32
    %268 = vector.broadcast %cst_29 : f32 to vector<1x128xf32>
    %269 = arith.addf %268, %267 : vector<1x128xf32>
    %270 = arith.mulf %137, %66 : vector<1x128xf32>
    %271 = arith.addf %269, %270 : vector<1x128xf32>
    %272 = arith.mulf %139, %71 : vector<1x128xf32>
    %273 = arith.addf %271, %272 : vector<1x128xf32>
    %274 = arith.mulf %136, %64 : vector<1x128xf32>
    %cst_30 = arith.constant 0.000000e+00 : f32
    %275 = vector.broadcast %cst_30 : f32 to vector<1x128xf32>
    %276 = arith.addf %275, %274 : vector<1x128xf32>
    %277 = arith.mulf %137, %69 : vector<1x128xf32>
    %278 = arith.addf %276, %277 : vector<1x128xf32>
    %279 = arith.mulf %139, %72 : vector<1x128xf32>
    %280 = arith.addf %278, %279 : vector<1x128xf32>
    %281 = arith.mulf %136, %65 : vector<1x128xf32>
    %cst_31 = arith.constant 0.000000e+00 : f32
    %282 = vector.broadcast %cst_31 : f32 to vector<1x128xf32>
    %283 = arith.addf %282, %281 : vector<1x128xf32>
    %284 = arith.mulf %137, %70 : vector<1x128xf32>
    %285 = arith.addf %283, %284 : vector<1x128xf32>
    %286 = arith.mulf %139, %75 : vector<1x128xf32>
    %287 = arith.addf %285, %286 : vector<1x128xf32>
    %288 = arith.mulf %214, %231 : vector<1x128xf32>
    %cst_32 = arith.constant 0.000000e+00 : f32
    %289 = vector.broadcast %cst_32 : f32 to vector<1x128xf32>
    %290 = arith.addf %289, %288 : vector<1x128xf32>
    %291 = arith.mulf %215, %252 : vector<1x128xf32>
    %292 = arith.addf %290, %291 : vector<1x128xf32>
    %293 = arith.mulf %216, %273 : vector<1x128xf32>
    %294 = arith.addf %292, %293 : vector<1x128xf32>
    %295 = arith.mulf %214, %238 : vector<1x128xf32>
    %cst_33 = arith.constant 0.000000e+00 : f32
    %296 = vector.broadcast %cst_33 : f32 to vector<1x128xf32>
    %297 = arith.addf %296, %295 : vector<1x128xf32>
    %298 = arith.mulf %215, %259 : vector<1x128xf32>
    %299 = arith.addf %297, %298 : vector<1x128xf32>
    %300 = arith.mulf %216, %280 : vector<1x128xf32>
    %301 = arith.addf %299, %300 : vector<1x128xf32>
    %302 = arith.mulf %214, %245 : vector<1x128xf32>
    %cst_34 = arith.constant 0.000000e+00 : f32
    %303 = vector.broadcast %cst_34 : f32 to vector<1x128xf32>
    %304 = arith.addf %303, %302 : vector<1x128xf32>
    %305 = arith.mulf %215, %266 : vector<1x128xf32>
    %306 = arith.addf %304, %305 : vector<1x128xf32>
    %307 = arith.mulf %216, %287 : vector<1x128xf32>
    %308 = arith.addf %306, %307 : vector<1x128xf32>
    %309 = arith.mulf %217, %231 : vector<1x128xf32>
    %cst_35 = arith.constant 0.000000e+00 : f32
    %310 = vector.broadcast %cst_35 : f32 to vector<1x128xf32>
    %311 = arith.addf %310, %309 : vector<1x128xf32>
    %312 = arith.mulf %219, %252 : vector<1x128xf32>
    %313 = arith.addf %311, %312 : vector<1x128xf32>
    %314 = arith.mulf %220, %273 : vector<1x128xf32>
    %315 = arith.addf %313, %314 : vector<1x128xf32>
    %316 = arith.mulf %217, %238 : vector<1x128xf32>
    %cst_36 = arith.constant 0.000000e+00 : f32
    %317 = vector.broadcast %cst_36 : f32 to vector<1x128xf32>
    %318 = arith.addf %317, %316 : vector<1x128xf32>
    %319 = arith.mulf %219, %259 : vector<1x128xf32>
    %320 = arith.addf %318, %319 : vector<1x128xf32>
    %321 = arith.mulf %220, %280 : vector<1x128xf32>
    %322 = arith.addf %320, %321 : vector<1x128xf32>
    %323 = arith.mulf %217, %245 : vector<1x128xf32>
    %cst_37 = arith.constant 0.000000e+00 : f32
    %324 = vector.broadcast %cst_37 : f32 to vector<1x128xf32>
    %325 = arith.addf %324, %323 : vector<1x128xf32>
    %326 = arith.mulf %219, %266 : vector<1x128xf32>
    %327 = arith.addf %325, %326 : vector<1x128xf32>
    %328 = arith.mulf %220, %287 : vector<1x128xf32>
    %329 = arith.addf %327, %328 : vector<1x128xf32>
    %330 = arith.mulf %221, %231 : vector<1x128xf32>
    %cst_38 = arith.constant 0.000000e+00 : f32
    %331 = vector.broadcast %cst_38 : f32 to vector<1x128xf32>
    %332 = arith.addf %331, %330 : vector<1x128xf32>
    %333 = arith.mulf %222, %252 : vector<1x128xf32>
    %334 = arith.addf %332, %333 : vector<1x128xf32>
    %335 = arith.mulf %224, %273 : vector<1x128xf32>
    %336 = arith.addf %334, %335 : vector<1x128xf32>
    %337 = arith.mulf %221, %238 : vector<1x128xf32>
    %cst_39 = arith.constant 0.000000e+00 : f32
    %338 = vector.broadcast %cst_39 : f32 to vector<1x128xf32>
    %339 = arith.addf %338, %337 : vector<1x128xf32>
    %340 = arith.mulf %222, %259 : vector<1x128xf32>
    %341 = arith.addf %339, %340 : vector<1x128xf32>
    %342 = arith.mulf %224, %280 : vector<1x128xf32>
    %343 = arith.addf %341, %342 : vector<1x128xf32>
    %344 = arith.mulf %221, %245 : vector<1x128xf32>
    %cst_40 = arith.constant 0.000000e+00 : f32
    %345 = vector.broadcast %cst_40 : f32 to vector<1x128xf32>
    %346 = arith.addf %345, %344 : vector<1x128xf32>
    %347 = arith.mulf %222, %266 : vector<1x128xf32>
    %348 = arith.addf %346, %347 : vector<1x128xf32>
    %349 = arith.mulf %224, %287 : vector<1x128xf32>
    %350 = arith.addf %348, %349 : vector<1x128xf32>
    %351 = vector.broadcast %24 : f32 to vector<1x128xf32>
    %352 = arith.mulf %294, %351 : vector<1x128xf32>
    %cst_41 = arith.constant 0.000000e+00 : f32
    %353 = vector.broadcast %cst_41 : f32 to vector<1x128xf32>
    %354 = arith.addf %353, %352 : vector<1x128xf32>
    %355 = vector.broadcast %27 : f32 to vector<1x128xf32>
    %356 = arith.mulf %301, %355 : vector<1x128xf32>
    %357 = arith.addf %354, %356 : vector<1x128xf32>
    %358 = vector.broadcast %30 : f32 to vector<1x128xf32>
    %359 = arith.mulf %308, %358 : vector<1x128xf32>
    %360 = arith.addf %357, %359 : vector<1x128xf32>
    %361 = vector.broadcast %25 : f32 to vector<1x128xf32>
    %362 = arith.mulf %294, %361 : vector<1x128xf32>
    %cst_42 = arith.constant 0.000000e+00 : f32
    %363 = vector.broadcast %cst_42 : f32 to vector<1x128xf32>
    %364 = arith.addf %363, %362 : vector<1x128xf32>
    %365 = vector.broadcast %28 : f32 to vector<1x128xf32>
    %366 = arith.mulf %301, %365 : vector<1x128xf32>
    %367 = arith.addf %364, %366 : vector<1x128xf32>
    %368 = vector.broadcast %31 : f32 to vector<1x128xf32>
    %369 = arith.mulf %308, %368 : vector<1x128xf32>
    %370 = arith.addf %367, %369 : vector<1x128xf32>
    %371 = vector.broadcast %26 : f32 to vector<1x128xf32>
    %372 = arith.mulf %294, %371 : vector<1x128xf32>
    %cst_43 = arith.constant 0.000000e+00 : f32
    %373 = vector.broadcast %cst_43 : f32 to vector<1x128xf32>
    %374 = arith.addf %373, %372 : vector<1x128xf32>
    %375 = vector.broadcast %29 : f32 to vector<1x128xf32>
    %376 = arith.mulf %301, %375 : vector<1x128xf32>
    %377 = arith.addf %374, %376 : vector<1x128xf32>
    %378 = vector.broadcast %32 : f32 to vector<1x128xf32>
    %379 = arith.mulf %308, %378 : vector<1x128xf32>
    %380 = arith.addf %377, %379 : vector<1x128xf32>
    %381 = vector.broadcast %24 : f32 to vector<1x128xf32>
    %382 = arith.mulf %315, %381 : vector<1x128xf32>
    %cst_44 = arith.constant 0.000000e+00 : f32
    %383 = vector.broadcast %cst_44 : f32 to vector<1x128xf32>
    %384 = arith.addf %383, %382 : vector<1x128xf32>
    %385 = vector.broadcast %27 : f32 to vector<1x128xf32>
    %386 = arith.mulf %322, %385 : vector<1x128xf32>
    %387 = arith.addf %384, %386 : vector<1x128xf32>
    %388 = vector.broadcast %30 : f32 to vector<1x128xf32>
    %389 = arith.mulf %329, %388 : vector<1x128xf32>
    %390 = arith.addf %387, %389 : vector<1x128xf32>
    %391 = vector.broadcast %25 : f32 to vector<1x128xf32>
    %392 = arith.mulf %315, %391 : vector<1x128xf32>
    %cst_45 = arith.constant 0.000000e+00 : f32
    %393 = vector.broadcast %cst_45 : f32 to vector<1x128xf32>
    %394 = arith.addf %393, %392 : vector<1x128xf32>
    %395 = vector.broadcast %28 : f32 to vector<1x128xf32>
    %396 = arith.mulf %322, %395 : vector<1x128xf32>
    %397 = arith.addf %394, %396 : vector<1x128xf32>
    %398 = vector.broadcast %31 : f32 to vector<1x128xf32>
    %399 = arith.mulf %329, %398 : vector<1x128xf32>
    %400 = arith.addf %397, %399 : vector<1x128xf32>
    %401 = vector.broadcast %26 : f32 to vector<1x128xf32>
    %402 = arith.mulf %315, %401 : vector<1x128xf32>
    %cst_46 = arith.constant 0.000000e+00 : f32
    %403 = vector.broadcast %cst_46 : f32 to vector<1x128xf32>
    %404 = arith.addf %403, %402 : vector<1x128xf32>
    %405 = vector.broadcast %29 : f32 to vector<1x128xf32>
    %406 = arith.mulf %322, %405 : vector<1x128xf32>
    %407 = arith.addf %404, %406 : vector<1x128xf32>
    %408 = vector.broadcast %32 : f32 to vector<1x128xf32>
    %409 = arith.mulf %329, %408 : vector<1x128xf32>
    %410 = arith.addf %407, %409 : vector<1x128xf32>
    %411 = vector.broadcast %24 : f32 to vector<1x128xf32>
    %412 = arith.mulf %336, %411 : vector<1x128xf32>
    %cst_47 = arith.constant 0.000000e+00 : f32
    %413 = vector.broadcast %cst_47 : f32 to vector<1x128xf32>
    %414 = arith.addf %413, %412 : vector<1x128xf32>
    %415 = vector.broadcast %27 : f32 to vector<1x128xf32>
    %416 = arith.mulf %343, %415 : vector<1x128xf32>
    %417 = arith.addf %414, %416 : vector<1x128xf32>
    %418 = vector.broadcast %30 : f32 to vector<1x128xf32>
    %419 = arith.mulf %350, %418 : vector<1x128xf32>
    %420 = arith.addf %417, %419 : vector<1x128xf32>
    %421 = vector.broadcast %25 : f32 to vector<1x128xf32>
    %422 = arith.mulf %336, %421 : vector<1x128xf32>
    %cst_48 = arith.constant 0.000000e+00 : f32
    %423 = vector.broadcast %cst_48 : f32 to vector<1x128xf32>
    %424 = arith.addf %423, %422 : vector<1x128xf32>
    %425 = vector.broadcast %28 : f32 to vector<1x128xf32>
    %426 = arith.mulf %343, %425 : vector<1x128xf32>
    %427 = arith.addf %424, %426 : vector<1x128xf32>
    %428 = vector.broadcast %31 : f32 to vector<1x128xf32>
    %429 = arith.mulf %350, %428 : vector<1x128xf32>
    %430 = arith.addf %427, %429 : vector<1x128xf32>
    %431 = vector.broadcast %26 : f32 to vector<1x128xf32>
    %432 = arith.mulf %336, %431 : vector<1x128xf32>
    %cst_49 = arith.constant 0.000000e+00 : f32
    %433 = vector.broadcast %cst_49 : f32 to vector<1x128xf32>
    %434 = arith.addf %433, %432 : vector<1x128xf32>
    %435 = vector.broadcast %29 : f32 to vector<1x128xf32>
    %436 = arith.mulf %343, %435 : vector<1x128xf32>
    %437 = arith.addf %434, %436 : vector<1x128xf32>
    %438 = vector.broadcast %32 : f32 to vector<1x128xf32>
    %439 = arith.mulf %350, %438 : vector<1x128xf32>
    %440 = arith.addf %437, %439 : vector<1x128xf32>
    %441 = vector.broadcast %15 : f32 to vector<1x128xf32>
    %442 = arith.mulf %441, %360 : vector<1x128xf32>
    %cst_50 = arith.constant 0.000000e+00 : f32
    %443 = vector.broadcast %cst_50 : f32 to vector<1x128xf32>
    %444 = arith.addf %443, %442 : vector<1x128xf32>
    %445 = vector.broadcast %16 : f32 to vector<1x128xf32>
    %446 = arith.mulf %445, %390 : vector<1x128xf32>
    %447 = arith.addf %444, %446 : vector<1x128xf32>
    %448 = vector.broadcast %17 : f32 to vector<1x128xf32>
    %449 = arith.mulf %448, %420 : vector<1x128xf32>
    %450 = arith.addf %447, %449 : vector<1x128xf32>
    %451 = vector.broadcast %15 : f32 to vector<1x128xf32>
    %452 = arith.mulf %451, %370 : vector<1x128xf32>
    %cst_51 = arith.constant 0.000000e+00 : f32
    %453 = vector.broadcast %cst_51 : f32 to vector<1x128xf32>
    %454 = arith.addf %453, %452 : vector<1x128xf32>
    %455 = vector.broadcast %16 : f32 to vector<1x128xf32>
    %456 = arith.mulf %455, %400 : vector<1x128xf32>
    %457 = arith.addf %454, %456 : vector<1x128xf32>
    %458 = vector.broadcast %17 : f32 to vector<1x128xf32>
    %459 = arith.mulf %458, %430 : vector<1x128xf32>
    %460 = arith.addf %457, %459 : vector<1x128xf32>
    %461 = vector.broadcast %15 : f32 to vector<1x128xf32>
    %462 = arith.mulf %461, %380 : vector<1x128xf32>
    %cst_52 = arith.constant 0.000000e+00 : f32
    %463 = vector.broadcast %cst_52 : f32 to vector<1x128xf32>
    %464 = arith.addf %463, %462 : vector<1x128xf32>
    %465 = vector.broadcast %16 : f32 to vector<1x128xf32>
    %466 = arith.mulf %465, %410 : vector<1x128xf32>
    %467 = arith.addf %464, %466 : vector<1x128xf32>
    %468 = vector.broadcast %17 : f32 to vector<1x128xf32>
    %469 = arith.mulf %468, %440 : vector<1x128xf32>
    %470 = arith.addf %467, %469 : vector<1x128xf32>
    %471 = vector.broadcast %18 : f32 to vector<1x128xf32>
    %472 = arith.mulf %471, %360 : vector<1x128xf32>
    %cst_53 = arith.constant 0.000000e+00 : f32
    %473 = vector.broadcast %cst_53 : f32 to vector<1x128xf32>
    %474 = arith.addf %473, %472 : vector<1x128xf32>
    %475 = vector.broadcast %19 : f32 to vector<1x128xf32>
    %476 = arith.mulf %475, %390 : vector<1x128xf32>
    %477 = arith.addf %474, %476 : vector<1x128xf32>
    %478 = vector.broadcast %20 : f32 to vector<1x128xf32>
    %479 = arith.mulf %478, %420 : vector<1x128xf32>
    %480 = arith.addf %477, %479 : vector<1x128xf32>
    %481 = vector.broadcast %18 : f32 to vector<1x128xf32>
    %482 = arith.mulf %481, %370 : vector<1x128xf32>
    %cst_54 = arith.constant 0.000000e+00 : f32
    %483 = vector.broadcast %cst_54 : f32 to vector<1x128xf32>
    %484 = arith.addf %483, %482 : vector<1x128xf32>
    %485 = vector.broadcast %19 : f32 to vector<1x128xf32>
    %486 = arith.mulf %485, %400 : vector<1x128xf32>
    %487 = arith.addf %484, %486 : vector<1x128xf32>
    %488 = vector.broadcast %20 : f32 to vector<1x128xf32>
    %489 = arith.mulf %488, %430 : vector<1x128xf32>
    %490 = arith.addf %487, %489 : vector<1x128xf32>
    %491 = vector.broadcast %18 : f32 to vector<1x128xf32>
    %492 = arith.mulf %491, %380 : vector<1x128xf32>
    %cst_55 = arith.constant 0.000000e+00 : f32
    %493 = vector.broadcast %cst_55 : f32 to vector<1x128xf32>
    %494 = arith.addf %493, %492 : vector<1x128xf32>
    %495 = vector.broadcast %19 : f32 to vector<1x128xf32>
    %496 = arith.mulf %495, %410 : vector<1x128xf32>
    %497 = arith.addf %494, %496 : vector<1x128xf32>
    %498 = vector.broadcast %20 : f32 to vector<1x128xf32>
    %499 = arith.mulf %498, %440 : vector<1x128xf32>
    %500 = arith.addf %497, %499 : vector<1x128xf32>
    %501 = vector.broadcast %21 : f32 to vector<1x128xf32>
    %502 = arith.mulf %501, %360 : vector<1x128xf32>
    %cst_56 = arith.constant 0.000000e+00 : f32
    %503 = vector.broadcast %cst_56 : f32 to vector<1x128xf32>
    %504 = arith.addf %503, %502 : vector<1x128xf32>
    %505 = vector.broadcast %22 : f32 to vector<1x128xf32>
    %506 = arith.mulf %505, %390 : vector<1x128xf32>
    %507 = arith.addf %504, %506 : vector<1x128xf32>
    %508 = vector.broadcast %23 : f32 to vector<1x128xf32>
    %509 = arith.mulf %508, %420 : vector<1x128xf32>
    %510 = arith.addf %507, %509 : vector<1x128xf32>
    %511 = vector.broadcast %21 : f32 to vector<1x128xf32>
    %512 = arith.mulf %511, %370 : vector<1x128xf32>
    %cst_57 = arith.constant 0.000000e+00 : f32
    %513 = vector.broadcast %cst_57 : f32 to vector<1x128xf32>
    %514 = arith.addf %513, %512 : vector<1x128xf32>
    %515 = vector.broadcast %22 : f32 to vector<1x128xf32>
    %516 = arith.mulf %515, %400 : vector<1x128xf32>
    %517 = arith.addf %514, %516 : vector<1x128xf32>
    %518 = vector.broadcast %23 : f32 to vector<1x128xf32>
    %519 = arith.mulf %518, %430 : vector<1x128xf32>
    %520 = arith.addf %517, %519 : vector<1x128xf32>
    %521 = vector.broadcast %21 : f32 to vector<1x128xf32>
    %522 = arith.mulf %521, %380 : vector<1x128xf32>
    %cst_58 = arith.constant 0.000000e+00 : f32
    %523 = vector.broadcast %cst_58 : f32 to vector<1x128xf32>
    %524 = arith.addf %523, %522 : vector<1x128xf32>
    %525 = vector.broadcast %22 : f32 to vector<1x128xf32>
    %526 = arith.mulf %525, %410 : vector<1x128xf32>
    %527 = arith.addf %524, %526 : vector<1x128xf32>
    %528 = vector.broadcast %23 : f32 to vector<1x128xf32>
    %529 = arith.mulf %528, %440 : vector<1x128xf32>
    %530 = arith.addf %527, %529 : vector<1x128xf32>
    %531 = vector.broadcast %36 : f32 to vector<1x128xf32>
    %532 = arith.mulf %3, %531 : vector<1x128xf32>
    %533 = vector.broadcast %37 : f32 to vector<1x128xf32>
    %534 = arith.mulf %4, %533 : vector<1x128xf32>
    %535 = vector.broadcast %38 : f32 to vector<1x128xf32>
    %536 = arith.mulf %5, %535 : vector<1x128xf32>
    %537 = arith.mulf %450, %532 : vector<1x128xf32>
    %cst_59 = arith.constant 0.000000e+00 : f32
    %538 = vector.broadcast %cst_59 : f32 to vector<1x128xf32>
    %539 = arith.addf %538, %537 : vector<1x128xf32>
    %540 = arith.mulf %460, %534 : vector<1x128xf32>
    %541 = arith.addf %539, %540 : vector<1x128xf32>
    %542 = arith.mulf %470, %536 : vector<1x128xf32>
    %543 = arith.addf %541, %542 : vector<1x128xf32>
    %544 = arith.mulf %480, %532 : vector<1x128xf32>
    %cst_60 = arith.constant 0.000000e+00 : f32
    %545 = vector.broadcast %cst_60 : f32 to vector<1x128xf32>
    %546 = arith.addf %545, %544 : vector<1x128xf32>
    %547 = arith.mulf %490, %534 : vector<1x128xf32>
    %548 = arith.addf %546, %547 : vector<1x128xf32>
    %549 = arith.mulf %500, %536 : vector<1x128xf32>
    %550 = arith.addf %548, %549 : vector<1x128xf32>
    %551 = arith.mulf %510, %532 : vector<1x128xf32>
    %cst_61 = arith.constant 0.000000e+00 : f32
    %552 = vector.broadcast %cst_61 : f32 to vector<1x128xf32>
    %553 = arith.addf %552, %551 : vector<1x128xf32>
    %554 = arith.mulf %520, %534 : vector<1x128xf32>
    %555 = arith.addf %553, %554 : vector<1x128xf32>
    %556 = arith.mulf %530, %536 : vector<1x128xf32>
    %557 = arith.addf %555, %556 : vector<1x128xf32>
    %558 = vector.broadcast %33 : f32 to vector<1x128xf32>
    %559 = arith.subf %558, %543 : vector<1x128xf32>
    %560 = vector.broadcast %34 : f32 to vector<1x128xf32>
    %561 = arith.subf %560, %550 : vector<1x128xf32>
    %562 = vector.broadcast %35 : f32 to vector<1x128xf32>
    %563 = arith.subf %562, %557 : vector<1x128xf32>
    %564 = arith.addf %543, %559 : vector<1x128xf32>
    %c0_62 = arith.constant 0 : index
    %c0_63 = arith.constant 0 : index
    %565 = vector.load %arg4[%c0_62, %c0_63] : memref<15x128xf32, #tpu.memory_space<vmem>>, vector<1x128xf32>
    tpu.vector_store %arg4[%c0_62, %c0_63], %564 {strides = array<i32>} : memref<15x128xf32, #tpu.memory_space<vmem>>, vector<1x128xf32>,
    %566 = arith.addf %550, %561 : vector<1x128xf32>
    %c1_64 = arith.constant 1 : index
    %c0_65 = arith.constant 0 : index
    %567 = vector.load %arg4[%c1_64, %c0_65] : memref<15x128xf32, #tpu.memory_space<vmem>>, vector<1x128xf32>
    tpu.vector_store %arg4[%c1_64, %c0_65], %566 {strides = array<i32>} : memref<15x128xf32, #tpu.memory_space<vmem>>, vector<1x128xf32>,
    %568 = arith.addf %557, %563 : vector<1x128xf32>
    %c2_66 = arith.constant 2 : index
    %c0_67 = arith.constant 0 : index
    %569 = vector.load %arg4[%c2_66, %c0_67] : memref<15x128xf32, #tpu.memory_space<vmem>>, vector<1x128xf32>
    tpu.vector_store %arg4[%c2_66, %c0_67], %568 {strides = array<i32>} : memref<15x128xf32, #tpu.memory_space<vmem>>, vector<1x128xf32>,
    %c0_68 = arith.constant 0 : index
    %570 = memref.load %arg2[%c0_68] : memref<12xf32, #tpu.memory_space<smem>>
    %571 = vector.broadcast %570 : f32 to vector<1x128xf32>
    %572 = arith.mulf %571, %3 : vector<1x128xf32>
    %c1_69 = arith.constant 1 : index
    %573 = memref.load %arg2[%c1_69] : memref<12xf32, #tpu.memory_space<smem>>
    %574 = vector.broadcast %573 : f32 to vector<1x128xf32>
    %575 = arith.mulf %574, %4 : vector<1x128xf32>
    %c2_70 = arith.constant 2 : index
    %576 = memref.load %arg2[%c2_70] : memref<12xf32, #tpu.memory_space<smem>>
    %577 = vector.broadcast %576 : f32 to vector<1x128xf32>
    %578 = arith.mulf %577, %5 : vector<1x128xf32>
    %579 = arith.mulf %450, %572 : vector<1x128xf32>
    %580 = arith.mulf %460, %575 : vector<1x128xf32>
    %581 = arith.addf %579, %580 : vector<1x128xf32>
    %582 = arith.mulf %470, %578 : vector<1x128xf32>
    %583 = arith.addf %581, %582 : vector<1x128xf32>
    %584 = arith.addf %583, %559 : vector<1x128xf32>
    %c3_71 = arith.constant 3 : index
    %c0_72 = arith.constant 0 : index
    %585 = vector.load %arg4[%c3_71, %c0_72] : memref<15x128xf32, #tpu.memory_space<vmem>>, vector<1x128xf32>
    tpu.vector_store %arg4[%c3_71, %c0_72], %584 {strides = array<i32>} : memref<15x128xf32, #tpu.memory_space<vmem>>, vector<1x128xf32>,
    %586 = arith.mulf %480, %572 : vector<1x128xf32>
    %587 = arith.mulf %490, %575 : vector<1x128xf32>
    %588 = arith.addf %586, %587 : vector<1x128xf32>
    %589 = arith.mulf %500, %578 : vector<1x128xf32>
    %590 = arith.addf %588, %589 : vector<1x128xf32>
    %591 = arith.addf %590, %561 : vector<1x128xf32>
    %c4_73 = arith.constant 4 : index
    %c0_74 = arith.constant 0 : index
    %592 = vector.load %arg4[%c4_73, %c0_74] : memref<15x128xf32, #tpu.memory_space<vmem>>, vector<1x128xf32>
    tpu.vector_store %arg4[%c4_73, %c0_74], %591 {strides = array<i32>} : memref<15x128xf32, #tpu.memory_space<vmem>>, vector<1x128xf32>,
    %593 = arith.mulf %510, %572 : vector<1x128xf32>
    %594 = arith.mulf %520, %575 : vector<1x128xf32>
    %595 = arith.addf %593, %594 : vector<1x128xf32>
    %596 = arith.mulf %530, %578 : vector<1x128xf32>
    %597 = arith.addf %595, %596 : vector<1x128xf32>
    %598 = arith.addf %597, %563 : vector<1x128xf32>
    %c5_75 = arith.constant 5 : index
    %c0_76 = arith.constant 0 : index
    %599 = vector.load %arg4[%c5_75, %c0_76] : memref<15x128xf32, #tpu.memory_space<vmem>>, vector<1x128xf32>
    tpu.vector_store %arg4[%c5_75, %c0_76], %598 {strides = array<i32>} : memref<15x128xf32, #tpu.memory_space<vmem>>, vector<1x128xf32>,
    %c3_77 = arith.constant 3 : index
    %600 = memref.load %arg2[%c3_77] : memref<12xf32, #tpu.memory_space<smem>>
    %601 = vector.broadcast %600 : f32 to vector<1x128xf32>
    %602 = arith.mulf %601, %3 : vector<1x128xf32>
    %c4_78 = arith.constant 4 : index
    %603 = memref.load %arg2[%c4_78] : memref<12xf32, #tpu.memory_space<smem>>
    %604 = vector.broadcast %603 : f32 to vector<1x128xf32>
    %605 = arith.mulf %604, %4 : vector<1x128xf32>
    %c5_79 = arith.constant 5 : index
    %606 = memref.load %arg2[%c5_79] : memref<12xf32, #tpu.memory_space<smem>>
    %607 = vector.broadcast %606 : f32 to vector<1x128xf32>
    %608 = arith.mulf %607, %5 : vector<1x128xf32>
    %609 = arith.mulf %450, %602 : vector<1x128xf32>
    %610 = arith.mulf %460, %605 : vector<1x128xf32>
    %611 = arith.addf %609, %610 : vector<1x128xf32>
    %612 = arith.mulf %470, %608 : vector<1x128xf32>
    %613 = arith.addf %611, %612 : vector<1x128xf32>
    %614 = arith.addf %613, %559 : vector<1x128xf32>
    %c6_80 = arith.constant 6 : index
    %c0_81 = arith.constant 0 : index
    %615 = vector.load %arg4[%c6_80, %c0_81] : memref<15x128xf32, #tpu.memory_space<vmem>>, vector<1x128xf32>
    tpu.vector_store %arg4[%c6_80, %c0_81], %614 {strides = array<i32>} : memref<15x128xf32, #tpu.memory_space<vmem>>, vector<1x128xf32>,
    %616 = arith.mulf %480, %602 : vector<1x128xf32>
    %617 = arith.mulf %490, %605 : vector<1x128xf32>
    %618 = arith.addf %616, %617 : vector<1x128xf32>
    %619 = arith.mulf %500, %608 : vector<1x128xf32>
    %620 = arith.addf %618, %619 : vector<1x128xf32>
    %621 = arith.addf %620, %561 : vector<1x128xf32>
    %c7_82 = arith.constant 7 : index
    %c0_83 = arith.constant 0 : index
    %622 = vector.load %arg4[%c7_82, %c0_83] : memref<15x128xf32, #tpu.memory_space<vmem>>, vector<1x128xf32>
    tpu.vector_store %arg4[%c7_82, %c0_83], %621 {strides = array<i32>} : memref<15x128xf32, #tpu.memory_space<vmem>>, vector<1x128xf32>,
    %623 = arith.mulf %510, %602 : vector<1x128xf32>
    %624 = arith.mulf %520, %605 : vector<1x128xf32>
    %625 = arith.addf %623, %624 : vector<1x128xf32>
    %626 = arith.mulf %530, %608 : vector<1x128xf32>
    %627 = arith.addf %625, %626 : vector<1x128xf32>
    %628 = arith.addf %627, %563 : vector<1x128xf32>
    %c8_84 = arith.constant 8 : index
    %c0_85 = arith.constant 0 : index
    %629 = vector.load %arg4[%c8_84, %c0_85] : memref<15x128xf32, #tpu.memory_space<vmem>>, vector<1x128xf32>
    tpu.vector_store %arg4[%c8_84, %c0_85], %628 {strides = array<i32>} : memref<15x128xf32, #tpu.memory_space<vmem>>, vector<1x128xf32>,
    %c6_86 = arith.constant 6 : index
    %630 = memref.load %arg2[%c6_86] : memref<12xf32, #tpu.memory_space<smem>>
    %631 = vector.broadcast %630 : f32 to vector<1x128xf32>
    %632 = arith.mulf %631, %3 : vector<1x128xf32>
    %c7_87 = arith.constant 7 : index
    %633 = memref.load %arg2[%c7_87] : memref<12xf32, #tpu.memory_space<smem>>
    %634 = vector.broadcast %633 : f32 to vector<1x128xf32>
    %635 = arith.mulf %634, %4 : vector<1x128xf32>
    %c8_88 = arith.constant 8 : index
    %636 = memref.load %arg2[%c8_88] : memref<12xf32, #tpu.memory_space<smem>>
    %637 = vector.broadcast %636 : f32 to vector<1x128xf32>
    %638 = arith.mulf %637, %5 : vector<1x128xf32>
    %639 = arith.mulf %450, %632 : vector<1x128xf32>
    %640 = arith.mulf %460, %635 : vector<1x128xf32>
    %641 = arith.addf %639, %640 : vector<1x128xf32>
    %642 = arith.mulf %470, %638 : vector<1x128xf32>
    %643 = arith.addf %641, %642 : vector<1x128xf32>
    %644 = arith.addf %643, %559 : vector<1x128xf32>
    %c9_89 = arith.constant 9 : index
    %c0_90 = arith.constant 0 : index
    %645 = vector.load %arg4[%c9_89, %c0_90] : memref<15x128xf32, #tpu.memory_space<vmem>>, vector<1x128xf32>
    tpu.vector_store %arg4[%c9_89, %c0_90], %644 {strides = array<i32>} : memref<15x128xf32, #tpu.memory_space<vmem>>, vector<1x128xf32>,
    %646 = arith.mulf %480, %632 : vector<1x128xf32>
    %647 = arith.mulf %490, %635 : vector<1x128xf32>
    %648 = arith.addf %646, %647 : vector<1x128xf32>
    %649 = arith.mulf %500, %638 : vector<1x128xf32>
    %650 = arith.addf %648, %649 : vector<1x128xf32>
    %651 = arith.addf %650, %561 : vector<1x128xf32>
    %c10_91 = arith.constant 10 : index
    %c0_92 = arith.constant 0 : index
    %652 = vector.load %arg4[%c10_91, %c0_92] : memref<15x128xf32, #tpu.memory_space<vmem>>, vector<1x128xf32>
    tpu.vector_store %arg4[%c10_91, %c0_92], %651 {strides = array<i32>} : memref<15x128xf32, #tpu.memory_space<vmem>>, vector<1x128xf32>,
    %653 = arith.mulf %510, %632 : vector<1x128xf32>
    %654 = arith.mulf %520, %635 : vector<1x128xf32>
    %655 = arith.addf %653, %654 : vector<1x128xf32>
    %656 = arith.mulf %530, %638 : vector<1x128xf32>
    %657 = arith.addf %655, %656 : vector<1x128xf32>
    %658 = arith.addf %657, %563 : vector<1x128xf32>
    %c11_93 = arith.constant 11 : index
    %c0_94 = arith.constant 0 : index
    %659 = vector.load %arg4[%c11_93, %c0_94] : memref<15x128xf32, #tpu.memory_space<vmem>>, vector<1x128xf32>
    tpu.vector_store %arg4[%c11_93, %c0_94], %658 {strides = array<i32>} : memref<15x128xf32, #tpu.memory_space<vmem>>, vector<1x128xf32>,
    %c9_95 = arith.constant 9 : index
    %660 = memref.load %arg2[%c9_95] : memref<12xf32, #tpu.memory_space<smem>>
    %661 = vector.broadcast %660 : f32 to vector<1x128xf32>
    %662 = arith.mulf %661, %3 : vector<1x128xf32>
    %c10_96 = arith.constant 10 : index
    %663 = memref.load %arg2[%c10_96] : memref<12xf32, #tpu.memory_space<smem>>
    %664 = vector.broadcast %663 : f32 to vector<1x128xf32>
    %665 = arith.mulf %664, %4 : vector<1x128xf32>
    %c11_97 = arith.constant 11 : index
    %666 = memref.load %arg2[%c11_97] : memref<12xf32, #tpu.memory_space<smem>>
    %667 = vector.broadcast %666 : f32 to vector<1x128xf32>
    %668 = arith.mulf %667, %5 : vector<1x128xf32>
    %669 = arith.mulf %450, %662 : vector<1x128xf32>
    %670 = arith.mulf %460, %665 : vector<1x128xf32>
    %671 = arith.addf %669, %670 : vector<1x128xf32>
    %672 = arith.mulf %470, %668 : vector<1x128xf32>
    %673 = arith.addf %671, %672 : vector<1x128xf32>
    %674 = arith.addf %673, %559 : vector<1x128xf32>
    %c12_98 = arith.constant 12 : index
    %c0_99 = arith.constant 0 : index
    %675 = vector.load %arg4[%c12_98, %c0_99] : memref<15x128xf32, #tpu.memory_space<vmem>>, vector<1x128xf32>
    tpu.vector_store %arg4[%c12_98, %c0_99], %674 {strides = array<i32>} : memref<15x128xf32, #tpu.memory_space<vmem>>, vector<1x128xf32>,
    %676 = arith.mulf %480, %662 : vector<1x128xf32>
    %677 = arith.mulf %490, %665 : vector<1x128xf32>
    %678 = arith.addf %676, %677 : vector<1x128xf32>
    %679 = arith.mulf %500, %668 : vector<1x128xf32>
    %680 = arith.addf %678, %679 : vector<1x128xf32>
    %681 = arith.addf %680, %561 : vector<1x128xf32>
    %c13_100 = arith.constant 13 : index
    %c0_101 = arith.constant 0 : index
    %682 = vector.load %arg4[%c13_100, %c0_101] : memref<15x128xf32, #tpu.memory_space<vmem>>, vector<1x128xf32>
    tpu.vector_store %arg4[%c13_100, %c0_101], %681 {strides = array<i32>} : memref<15x128xf32, #tpu.memory_space<vmem>>, vector<1x128xf32>,
    %683 = arith.mulf %510, %662 : vector<1x128xf32>
    %684 = arith.mulf %520, %665 : vector<1x128xf32>
    %685 = arith.addf %683, %684 : vector<1x128xf32>
    %686 = arith.mulf %530, %668 : vector<1x128xf32>
    %687 = arith.addf %685, %686 : vector<1x128xf32>
    %688 = arith.addf %687, %563 : vector<1x128xf32>
    %c14_102 = arith.constant 14 : index
    %c0_103 = arith.constant 0 : index
    %689 = vector.load %arg4[%c14_102, %c0_103] : memref<15x128xf32, #tpu.memory_space<vmem>>, vector<1x128xf32>
    tpu.vector_store %arg4[%c14_102, %c0_103], %688 {strides = array<i32>} : memref<15x128xf32, #tpu.memory_space<vmem>>, vector<1x128xf32>,
    return
  }
  func.func @transform_0(%arg0: i32) -> i32 {
    %c0_i32 = arith.constant 0 : i32
    %c0_i32_0 = arith.constant 0 : i32
    return %c0_i32 : i32
  }
  func.func @transform_1(%arg0: i32) -> i32 {
    %c0_i32 = arith.constant 0 : i32
    %c0_i32_0 = arith.constant 0 : i32
    return %c0_i32 : i32
  }
  func.func @transform_2(%arg0: i32) -> (i32, i32) {
    %c0_i32 = arith.constant 0 : i32
    %c0_i32_0 = arith.constant 0 : i32
    return %c0_i32, %arg0 : i32, i32
  }
  func.func @transform_3(%arg0: i32) -> (i32, i32) {
    %c0_i32 = arith.constant 0 : i32
    %c0_i32_0 = arith.constant 0 : i32
    return %c0_i32, %arg0 : i32, i32
  }
}

</mosaic_0001>

<bundles_post_ra>
// kernel: _lambda_.1
= control target key start
LH: loop header
LB: loop body
LE: loop exit
PB: predicated region body
PF: predicated region fallthrough
CT: control target
= control target key end

     0   :  { %8 = vsyncpa [#allocation3], 0  ;;  %s2354_s0 = inlined_call_operand.vmem [shape: f32[33], index: 0, kind: input, shape index: {}]   ;;  %s2355_s1 = inlined_call_operand.vmem [shape: f32[12], index: 1, kind: input, shape index: {}]   ;;  %s2356_s2 = inlined_call_operand.vmem [shape: f32[6,128], index: 2, kind: input, shape index: {}]   ;;  %s2357_s3 = inlined_call_operand.vmem [shape: f32[15,128], index: 3, kind: output, shape index: {}]  }
   0x1   :  { %s16_s14 = sshll.u32 %s2354_s0, 4  ;;  %s17_s14 = int_to_ptr.vmem [resolvable:$true] %s16_s14 }
   0x2   :  { %9 = vsyncpa [#allocation5], 0  ;;  %s26_s17 = sshll.u32 %s2355_s1, 4  ;;  %s1345_s18 = scalar_lea.vmem %s17_s14, 16  ;;  %s27_s17 = int_to_ptr.vmem [resolvable:$true] %s26_s17 }
   0x3   :  { %p1346_p0 = scmp.ne.s32.totalorder %s17_s14, %s1345_s18  ;;  %p1350_p1 = scmp.lt.s32.totalorder %s17_s14, %s17_s14 }
   0x4   :  { %p1351_p2 = scmp.lt.s32.totalorder %s1345_s18, %s1345_s18 }
   0x6   :  { %p1352_p3 = por %p1351_p2, %p1350_p1 }
   0x8   :  { %p1353_p4 = pnand %p1352_p3, %p1346_p0 }
   0xa   :  { %1356 = shalt.err (!%p1353_p4)
}
   0xb   :  { %s1373_s19 = smov [#allocation2]   ;;  %s1357_s20 = scalar_lea.vmem %s27_s17, 16 }
   0xc   :  { %19 = dma.vmem_to_smem %s17_s14, 16, %s1373_s19, [#allocation3]  }
   0xd   :  { %p1358_p5 = scmp.ne.s32.totalorder %s27_s17, %s1357_s20  ;;  %p1362_p6 = scmp.lt.s32.totalorder %s27_s17, %s27_s17 }
   0xe   :  { %p1363_p7 = scmp.lt.s32.totalorder %s1357_s20, %s1357_s20 }
  0x10   :  { %p1364_p8 = por %p1363_p7, %p1362_p6 }
  0x12   :  { %p1365_p9 = pnand %p1364_p8, %p1358_p5 }
  0x14   :  { %1368 = shalt.err (!%p1365_p9)
}
  0x15   :  { %s1374_s0 = smov [#allocation4]  }
  0x16   :  { %29 = dma.vmem_to_smem %s27_s17, 16, %s1374_s0, [#allocation5]  }
  0x17   :  { %1369 = dma.done.wait [#allocation3], 16  }
  0x18   :  { %1370 = vsyncadd [#allocation3], 4294967280 }
  0x19   :  { %1371 = dma.done.wait [#allocation5], 16  }
  0x1a   :  { %1372 = vsyncadd [#allocation5], 4294967280 }
  0x1b   :  { %38 = sfence }
  0x1c   :  { %v1410_v0 = vld [vmem:[%s2356_s2] sm:$0x1]  ;;  %v1417_v3 = vld [vmem:[%s2356_s2 + $0x1] sm:$0x1]  ;;  %v1375_v17 = vmov 683565275  }
  0x1d   :  { %v78_v1 = vand.u32 2147483647, %v1410_v0  ;;  %v81_v2 = vand.u32 2139095040, %v1410_v0  ;;  %v343_v7 = vand.u32 2139095040, %v1417_v3  ;;  %v1376_v19 = vmov 2475754826  }
  0x1e   :  { %v1377_v21 = vmov 2131351028   ;;  %v1378_v26 = vmov 2102212464   ;;  %v1379_v29 = vmov 920167782  }
  0x1f   :  { %v82_v4 = vshrl.u32 %v81_v2, 23  ;;  %v85_v5 = vand.u32 8388607, %v78_v1  ;;  %v344_v10 = vshrl.u32 %v343_v7, 23  ;;  %v1380_v32 = vmov 1326507024  }
  0x20   :  { %v340_v48 = vand.u32 2147483647, %v1417_v3  ;;  %v1448_v57 = vld [vmem:[%s2356_s2 + $0x2] sm:$0x1]  ;;  %vm80_vm14 = vcmp.lt.s32.totalorder %v1410_v0, 0  ;;  %s1548_s26 = sld [smem:[#allocation2]] }
  0x21   :  { %v1274_v6 = vadd.s32 4294967169, %v82_v4  ;;  %v86_v8 = vor.u32 8388608, %v85_v5  ;;  %v1282_v15 = vadd.s32 4294967169, %v344_v10  ;;  %v620_v2 = vand.u32 2139095040, %v1448_v57  ;;  %s1550_s27 = sld [smem:[#allocation2 + $0x1]]  ;;  %s1560_s28 = sld [smem:[#allocation2 + $0x2]] }
  0x22   :  { %v347_v58 = vand.u32 8388607, %v340_v48  ;;  %s1566_s29 = sld [smem:[#allocation2 + $0x3]]  ;;  %s1568_s30 = sld [smem:[#allocation2 + $0x4]] }
  0x23   :  { %v88_v9 = vadd.s32 1, %v1274_v6  ;;  %v1422_v13 = vshll.u32 %v86_v8, 8  ;;  %v350_v52 = vadd.s32 1, %v1282_v15  ;;  %s1572_s4 = sld [smem:[#allocation2 + $0x5]]  ;;  %s1582_s5 = sld [smem:[#allocation2 + $0x6]] }
  0x24   :  { %v348_v4 = vor.u32 8388608, %v347_v58  ;;  %s1586_s6 = sld [smem:[#allocation2 + $0x7]]  ;;  %s1601_s7 = sld [smem:[#allocation2 + $0x8]] }
  0x25   :  { %vm89_vm0 = vcmp.gt.s32.totalorder %v88_v9, 0  ;;  %vm351_vm5 = vcmp.gt.s32.totalorder %v350_v52, 0  ;;  %s1603_s8 = sld [smem:[#allocation2 + $0x12]]  ;;  %s1615_s9 = sld [smem:[#allocation2 + $0x15]] }
  0x26   :  { %v90_v11 = vsel %vm89_vm0, %v88_v9, 0  ;;  %v352_v59 = vsel %vm351_vm5, %v350_v52, 0  ;;  %vm170_vm5 = vweird.f32 %v1410_v0  ;;  %s1646_s10 = sld [smem:[#allocation2 + $0x13]]  ;;  %s1651_s11 = sld [smem:[#allocation2 + $0x16]] }
  0x27   :  { %v92_v12 = vand.u32 31, %v90_v11  ;;  %v91_v14 = vshrl.u32 %v90_v11, 5  ;;  %v353_v61 = vshrl.u32 %v352_v59, 5  ;;  %v354_v62 = vand.u32 31, %v352_v59  ;;  %s1653_s12 = sld [smem:[#allocation2 + $0x18]]  ;;  %s1661_s13 = sld [smem:[#allocation2 + $0x14]] }
  0x28   :  { %s1663_s14 = sld [smem:[#allocation2 + $0x19]]  ;;  %s1677_s16 = sld [smem:[#allocation2 + $0x17]] }
  0x29   :  { %v93_v16 = vsub.s32 32, %v92_v12  ;;  %v95_v18 = vshll.u32 %v1375_v17, %v92_v12  ;;  %v98_v20 = vshll.u32 %v1376_v19, %v92_v12  ;;  %v101_v22 = vshll.u32 %v1377_v21, %v92_v12  ;;  %s1669_s15 = sld [smem:[#allocation2 + $0x9]]  ;;  %s1679_s17 = sld [smem:[#allocation2 + $0x1a]] }
  0x2a   :  { %v104_v28 = vshll.u32 %v1378_v26, %v92_v12  ;;  %v107_v31 = vshll.u32 %v1379_v29, %v92_v12  ;;  %vm110_vm1 = vcmp.lt.s32.totalorder %v91_v14, 1  ;;  %vm111_vm2 = vcmp.lt.s32.totalorder %v91_v14, 2  ;;  %s1689_s18 = sld [smem:[#allocation2 + $0x1e]]  ;;  %s1691_s19 = sld [smem:[#allocation2 + $0x1f]] }
  0x2b   :  { %v94_v23 = vshrl.u32 %v1375_v17, %v93_v16  ;;  %v96_v24 = vshrl.u32 %v1376_v19, %v93_v16  ;;  %v99_v25 = vshrl.u32 %v1377_v21, %v93_v16  ;;  %v102_v27 = vshrl.u32 %v1378_v26, %v93_v16  ;;  %s1701_s20 = sld [smem:[#allocation2 + $0xa]]  ;;  %s1703_s0 = sld [smem:[#allocation2 + $0x20]] }
  0x2c   :  { %v105_v30 = vshrl.u32 %v1379_v29, %v93_v16  ;;  %v108_v33 = vshrl.u32 %v1380_v32, %v93_v16  ;;  %vm112_vm3 = vcmp.lt.s32.totalorder %v91_v14, 3  ;;  %vm113_vm4 = vcmp.lt.s32.totalorder %v91_v14, 4  ;;  %s1713_s1 = sld [smem:[#allocation2 + $0xb]]  ;;  %s1739_s22 = sld [smem:[#allocation2 + $0xc]] }
  0x2d   :  { %v97_v34 = vor.u32 %v96_v24, %v95_v18  ;;  %v100_v35 = vor.u32 %v99_v25, %v98_v20  ;;  %v103_v36 = vor.u32 %v102_v27, %v101_v22  ;;  %v355_v5 = vsub.s32 32, %v354_v62  ;;  %s1723_s21 = sld [smem:[#allocation2 + $0x1b]]  ;;  %s1741_s23 = sld [smem:[#allocation2 + $0xd]] }
  0x2e   :  { %v106_v37 = vor.u32 %v105_v30, %v104_v28  ;;  %v109_v38 = vor.u32 %v108_v33, %v107_v31  ;;  %v357_v6 = vshll.u32 %v1375_v17, %v354_v62  ;;  %v360_v7 = vshll.u32 %v1376_v19, %v354_v62  ;;  %s1753_s24 = sld [smem:[#allocation2 + $0xe]]  ;;  %s1755_s25 = sld [smem:[#allocation2 + $0xf]] }
  0x2f   :  { %v114_v39 = vsel %vm110_vm1, %v94_v23, %v97_v34  ;;  %v118_v40 = vsel %vm110_vm1, %v97_v34, %v100_v35  ;;  %v122_v41 = vsel %vm110_vm1, %v100_v35, %v103_v36  ;;  %v115_v42 = vsel %vm113_vm4, %v103_v36, 2102212464 }
  0x30   :  { %v119_v43 = vsel %vm113_vm4, %v106_v37, 920167782  ;;  %v123_v44 = vsel %vm113_vm4, %v109_v38, 1326507024  ;;  %v116_v45 = vsel %vm112_vm3, %v100_v35, %v115_v42  ;;  %v363_v9 = vshll.u32 %v1377_v21, %v354_v62 }
  0x31   :  { %v120_v46 = vsel %vm112_vm3, %v103_v36, %v119_v43  ;;  %v124_v47 = vsel %vm112_vm3, %v106_v37, %v123_v44  ;;  %v117_v49 = vsel %vm111_vm2, %v114_v39, %v116_v45  ;;  %v366_v10 = vshll.u32 %v1378_v26, %v354_v62 }
  0x32   :  { %v121_v50 = vsel %vm111_vm2, %v118_v40, %v120_v46  ;;  %v125_v51 = vsel %vm111_vm2, %v122_v41, %v124_v47  ;;  %v133_v60 = vmul.u32 %v1422_v13, %v117_v49  ;;  %v369_v11 = vshll.u32 %v1379_v29, %v354_v62 }
  0x33   :  { %v1437_v53 = vmul.u32.u64.low %v1422_v13, %v125_v51  ;;  %v1438_v54 = vmul.u32.u64.high %v1422_v13, %v125_v51, %v1437_v53  ;;  %v1441_v55 = vmul.u32.u64.low %v1422_v13, %v121_v50  ;;  %v1442_v56 = vmul.u32.u64.high %v1422_v13, %v121_v50, %v1441_v55 }
  0x34   :  { %v358_v13 = vshrl.u32 %v1376_v19, %v355_v5  ;;  %v361_v14 = vshrl.u32 %v1377_v21, %v355_v5  ;;  %vm372_vm7 = vcmp.lt.s32.totalorder %v353_v61, 1  ;;  %v356_v15 = vshrl.u32 %v1375_v17, %v355_v5 }
  0x35   :  { %vm135_vm6 = vc.u32 %v1438_v54, %v1441_v55  ;;  %v136_v63 = vadd.s32 1, %v1442_v56  ;;  %v364_v16 = vshrl.u32 %v1378_v26, %v355_v5  ;;  %v367_v18 = vshrl.u32 %v1379_v29, %v355_v5 }
  0x36   :  { %v370_v20 = vshrl.u32 %v1380_v32, %v355_v5  ;;  %v359_v23 = vor.u32 %v358_v13, %v357_v6  ;;  %v362_v24 = vor.u32 %v361_v14, %v360_v7  ;;  %vm374_vm8 = vcmp.lt.s32.totalorder %v353_v61, 3 }
  0x37   :  { %v137_v8 = vsel %vm135_vm6, %v136_v63, %v1442_v56  ;;  %v365_v25 = vor.u32 %v364_v16, %v363_v9  ;;  %v368_v27 = vor.u32 %v367_v18, %v366_v10  ;;  %vm375_vm9 = vcmp.lt.s32.totalorder %v353_v61, 4 }
  0x38   :  { %v138_v12 = vadd.s32 %v137_v8, %v133_v60  ;;  %v371_v28 = vor.u32 %v370_v20, %v369_v11  ;;  %vm373_vm10 = vcmp.lt.s32.totalorder %v353_v61, 2  ;;  %v380_v31 = vsel %vm372_vm7, %v359_v23, %v362_v24 }
  0x39   :  { %v388_v33 = vshll.u32 %v348_v4, 8  ;;  %v377_v34 = vsel %vm375_vm9, %v365_v25, 2102212464  ;;  %v381_v35 = vsel %vm375_vm9, %v368_v27, 920167782  ;;  %v384_v36 = vsel %vm372_vm7, %v362_v24, %v365_v25 }
  0x3a   :  { %v139_v22 = vadd.s32 536870912, %v138_v12  ;;  %v385_v37 = vsel %vm375_vm9, %v371_v28, 1326507024  ;;  %v382_v39 = vsel %vm374_vm8, %v365_v25, %v381_v35  ;;  %v376_v40 = vsel %vm372_vm7, %v356_v15, %v359_v23 }
  0x3b   :  { %v386_v41 = vsel %vm374_vm8, %v368_v27, %v385_v37  ;;  %v621_v42 = vshrl.u32 %v620_v2, 23  ;;  %v378_v44 = vsel %vm374_vm8, %v362_v24, %v377_v34  ;;  %v383_v45 = vsel %vm373_vm10, %v380_v31, %v382_v39 }
  0x3c   :  { %v1469_v30 = vshrl.u32 %v139_v22, 30  ;;  %v387_v46 = vsel %vm373_vm10, %v384_v36, %v386_v41  ;;  %v379_v52 = vsel %vm373_vm10, %v376_v40, %v378_v44  ;;  %v617_v61 = vand.u32 2147483647, %v1448_v57 }
  0x3d   :  { %v1480_v47 = vmul.u32.u64.low %v388_v33, %v387_v46  ;;  %v1481_v49 = vmul.u32.u64.high %v388_v33, %v387_v46, %v1480_v47  ;;  %v1290_v50 = vadd.s32 4294967169, %v621_v42  ;;  %v395_v62 = vmul.u32 %v388_v33, %v379_v52 }
  0x3e   :  { %v141_v38 = vshll.u32 %v1469_v30, 30  ;;  %v1484_v53 = vmul.u32.u64.low %v388_v33, %v383_v45  ;;  %v1485_v56 = vmul.u32.u64.high %v388_v33, %v383_v45, %v1484_v53  ;;  %v134_v7 = vadd.s32 %v1441_v55, %v1438_v54 }
  0x3f   :  { %v627_v58 = vadd.s32 1, %v1290_v50  ;;  %v624_v15 = vand.u32 8388607, %v617_v61  ;;  %v164_v36 = vsub.s32 4, %v1469_v30  ;;  %vm79_vm3 = vcmp.le.f32.partialorder %v78_v1, 0.7853982 }
  0x40   :  { %v142_v43 = vsub.s32 %v138_v12, %v141_v38  ;;  %vm397_vm11 = vc.u32 %v1481_v49, %v1484_v53  ;;  %v398_v63 = vadd.s32 1, %v1485_v56  ;;  %vm342_vm6 = vcmp.lt.s32.totalorder %v1417_v3, 0 }
  0x41   :  { %vm628_vm12 = vcmp.gt.s32.totalorder %v627_v58, 0  ;;  %v625_v37 = vor.u32 8388608, %v624_v15 }
  0x42   :  { %v144_v51 = vsub.s32 0, %v142_v43  ;;  %v629_v4 = vsel %vm628_vm12, %v627_v58, 0  ;;  %v399_v5 = vsel %vm397_vm11, %v398_v63, %v1485_v56 }
  0x43   :  { %v631_v6 = vand.u32 31, %v629_v4  ;;  %v400_v8 = vadd.s32 %v399_v5, %v395_v62  ;;  %v1497_v16 = vshrl.u32 %v629_v4, 5 }
  0x44   :  { %v1275_v59 = vmin.u32 %v144_v51, %v142_v43  ;;  %v1525_v51 = vshll.u32 %v625_v37, 8 }
  0x45   :  { %v632_v10 = vsub.s32 32, %v631_v6  ;;  %v401_v14 = vadd.s32 536870912, %v400_v8  ;;  %v634_v18 = vshll.u32 %v1375_v17, %v631_v6  ;;  %v637_v20 = vshll.u32 %v1376_v19, %v631_v6 }
  0x46   :  { %v146_v60 = vclz %v1275_v59  ;;  %v640_v25 = vshll.u32 %v1377_v21, %v631_v6  ;;  %v643_v27 = vshll.u32 %v1378_v26, %v631_v6  ;;  %v646_v38 = vshll.u32 %v1379_v29, %v631_v6 }
  0x47   :  { %v1501_v54 = vshrl.u32 %v401_v14, 30  ;;  %v635_v55 = vshrl.u32 %v1376_v19, %v632_v10  ;;  %v638_v24 = vshrl.u32 %v1377_v21, %v632_v10  ;;  %v644_v28 = vshrl.u32 %v1379_v29, %v632_v10 }
  0x48   :  { %v1276_v2 = vadd.s32 4294967294, %v146_v60  ;;  %v641_v35 = vshrl.u32 %v1378_v26, %v632_v10  ;;  %v647_v21 = vshrl.u32 %v1380_v32, %v632_v10  ;;  %vm649_vm15 = vcmp.lt.s32.totalorder %v1497_v16, 1 }
  0x49   :  { %v403_v34 = vshll.u32 %v1501_v54, 30  ;;  %v636_v41 = vor.u32 %v635_v55, %v634_v18  ;;  %v639_v42 = vor.u32 %v638_v24, %v637_v20  ;;  %v165_v29 = vsel %vm80_vm14, %v164_v36, %v1469_v30 }
  0x4a   :  { %vm1277_vm13 = vcmp.lt.s32.totalorder %v1276_v2, 0  ;;  %v642_v26 = vor.u32 %v641_v35, %v640_v25  ;;  %v633_v46 = vshrl.u32 %v1375_v17, %v632_v10  ;;  %vm651_vm0 = vcmp.lt.s32.totalorder %v1497_v16, 3 }
  0x4b   :  { %v149_v9 = vsel %vm1277_vm13, 0, %v1276_v2  ;;  %v1512_v40 = vsub.s32 %v400_v8, %v403_v34  ;;  %vm652_vm1 = vcmp.lt.s32.totalorder %v1497_v16, 4  ;;  %v648_v50 = vor.u32 %v647_v21, %v646_v38 }
  0x4c   :  { %v150_v11 = vsub.s32 32, %v149_v9  ;;  %v151_v12 = vshll.u32 %v142_v43, %v149_v9  ;;  %v154_v13 = vsub.s32 4294967266, %v149_v9  ;;  %v645_v43 = vor.u32 %v644_v28, %v643_v27 }
  0x4d   :  { %v406_v45 = vsub.s32 0, %v1512_v40  ;;  %vm650_vm2 = vcmp.lt.s32.totalorder %v1497_v16, 2  ;;  %v654_v52 = vsel %vm652_vm1, %v642_v26, 2102212464  ;;  %v657_v30 = vsel %vm649_vm15, %v636_v41, %v639_v42 }
  0x4e   :  { %v152_v22 = vshrl.u32 %v134_v7, %v150_v11  ;;  %v155_v23 = vadd.s32 127, %v154_v13  ;;  %v658_v17 = vsel %vm652_vm1, %v645_v43, 920167782  ;;  %v167_v60 = vsel %vm79_vm3, 0, %v165_v29 }
  0x4f   :  { %v1283_v47 = vmin.u32 %v406_v45, %v1512_v40  ;;  %v659_v59 = vsel %vm651_vm0, %v642_v26, %v658_v17  ;;  %v653_v62 = vsel %vm649_vm15, %v633_v46, %v636_v41  ;;  %v655_v63 = vsel %vm651_vm0, %v639_v42, %v654_v52 }
  0x50   :  { %v153_v31 = vor.u32 %v152_v22, %v151_v12  ;;  %v156_v33 = vshll.u32 %v155_v23, 23  ;;  %v660_v5 = vsel %vm650_vm2, %v657_v30, %v659_v59  ;;  %v661_v1 = vsel %vm649_vm15, %v639_v42, %v642_v26 }
  0x51   :  { %v408_v58 = vclz %v1283_v47  ;;  %v662_v7 = vsel %vm652_vm1, %v648_v50, 1326507024  ;;  %v1556_v8 = vmul.u32.u64.low %v1525_v51, %v660_v5  ;;  %v1557_v9 = vmul.u32.u64.high %v1525_v51, %v660_v5, %v1556_v8 }
  0x52   :  { %v157_v19 = vor.u32 4788187, %v156_v33  ;;  %v160_v39 = vcvt.s32.f32 %v153_v31  ;;  %v396_v10 = vadd.s32 %v1484_v53, %v1481_v49  ;;  %v663_v11 = vsel %vm651_vm0, %v645_v43, %v662_v7 }
  0x53   :  { %v1284_v4 = vadd.s32 4294967294, %v408_v58  ;;  %v274_v12 = vadd.s32 3, %v167_v60  ;;  %v664_v14 = vsel %vm650_vm2, %v661_v1, %v663_v11  ;;  %v656_v18 = vsel %vm650_vm2, %v653_v62, %v655_v63 }
  0x54   :  { %v158_v44 = vand.u32 2147483647, %v157_v19  ;;  %v1578_v20 = vmul.u32.u64.low %v1525_v51, %v664_v14  ;;  %v1579_v22 = vmul.u32.u64.high %v1525_v51, %v664_v14, %v1578_v20  ;;  %v675_v24 = vadd.s32 1, %v1557_v9 }
  0x55   :  { %vm1285_vm4 = vcmp.lt.s32.totalorder %v1284_v4, 0  ;;  %v672_v25 = vmul.u32 %v1525_v51, %v656_v18  ;;  %v171_v27 = vand.u32 3, %v167_v60  ;;  %v275_v16 = vand.u32 3, %v274_v12 }
  0x56   :  { %v161_v32 = vmul.f32 %v160_v39, %v158_v44  ;;  %v411_v13 = vsel %vm1285_vm4, 0, %v1284_v4  ;;  %v1589_v33 = vstv %s1548_s26  ;;  %v1592_v34 = vstv %s1550_s27  ;;  %s1764_s26 = sld [smem:[#allocation2 + $0x1c]] }
  0x57   :  { %v412_v15 = vsub.s32 32, %v411_v13  ;;  %v413_v49 = vshll.u32 %v1512_v40, %v411_v13  ;;  %v416_v53 = vsub.s32 4294967266, %v411_v13  ;;  %vm674_vm7 = vc.u32 %v1579_v22, %v1556_v8 }
  0x58   :  { %v162_v56 = vxor.u32 2147483648, %v161_v32  ;;  %v1598_v35 = vstv %s1560_s28  ;;  %v676_v38 = vsel %vm674_vm7, %v675_v24, %v1557_v9  ;;  %v1606_v19 = vstv %s1566_s29  ;;  %s1782_s29 = sld [smem:[#allocation2 + $0x10]] }
  0x59   :  { %v414_v23 = vshrl.u32 %v396_v10, %v412_v15  ;;  %v417_v55 = vadd.s32 127, %v416_v53  ;;  %v1609_v39 = vstv %s1568_s30  ;;  %v426_v40 = vsub.s32 4, %v1501_v54  ;;  %s1784_s30 = sld [smem:[#allocation2 + $0x11]] }
  0x5a   :  { %v163_v2 = vsel %vm80_vm14, %v162_v56, %v161_v32  ;;  %v677_v21 = vadd.s32 %v676_v38, %v672_v25  ;;  %vm176_vm8 = vcmp.eq.s32.totalorder %v171_v27, 2  ;;  %vm280_vm9 = vcmp.eq.s32.totalorder %v275_v16, 2 }
  0x5b   :  { %v166_v6 = vsel %vm79_vm3, %v1410_v0, %v163_v2  ;;  %v415_v28 = vor.u32 %v414_v23, %v413_v49  ;;  %v418_v31 = vshll.u32 %v417_v55, 23  ;;  %v1613_v42 = vstv %s1572_s4 }
  0x5c   :  { %1329 = vcosq.f32 %v166_v6  ;;  %vm173_vm10 = vcmp.eq.s32.totalorder %v171_v27, 0  ;;  %vm277_vm11 = vcmp.eq.s32.totalorder %v275_v16, 0  ;;  %v678_v26 = vadd.s32 536870912, %v677_v21 }
  0x5d   :  { %1331 = vsinq.f32 %v166_v6  ;;  %v419_v36 = vor.u32 4788187, %v418_v31  ;;  %v422_v37 = vcvt.s32.f32 %v415_v28  ;;  %vm172_vm12 = vcmp.lt.s32.totalorder %v171_v27, 2 }
  0x5e   :  { %vm276_vm13 = vcmp.lt.s32.totalorder %v275_v16, 2  ;;  %v427_v50 = vsel %vm342_vm6, %v426_v40, %v1501_v54  ;;  %v1621_v51 = vstv %s1582_s5  ;;  %v1623_v56 = vshrl.u32 %v678_v26, 30 }
  0x5f   :  { %v420_v43 = vand.u32 2147483647, %v419_v36  ;;  %vm341_vm14 = vcmp.le.f32.partialorder %v340_v48, 0.7853982  ;;  %v1628_v60 = vstv %s1586_s6  ;;  %v1637_v1 = vstv %s1601_s7  ;;  %s1798_s6 = sld [smem:[#allocation2 + $0x1d]]  ;;  %s1800_s7 = sld [smem:[#allocation4]] }
  0x60   :  { %v429_v2 = vsel %vm341_vm14, 0, %v427_v50  ;;  %v1640_v6 = vstv %s1603_s8  ;;  %v680_v0 = vshll.u32 %v1623_v56, 30  ;;  %v1659_v15 = vstv %s1615_s9 }
  0x61   :  { %v423_v46 = vmul.f32 %v422_v37, %v420_v43  ;;  %v536_v5 = vadd.s32 3, %v429_v2  ;;  %v1656_v14 = vand.u32 3, %v429_v2  ;;  %v1731_v50 = vstv %s1653_s12  ;;  %s1933_s12 = sld [smem:[#allocation4 + $0x4]] }
  0x62   :  { %v1675_v25 = vsub.s32 %v677_v21, %v680_v0  ;;  %vm619_vm4 = vcmp.lt.s32.totalorder %v1448_v57, 0  ;;  %v1080_v0 = vstv %s1689_s18  ;;  %vm1840_vm7 = vcmp.le.f32.partialorder %v617_v61, 0.7853982  ;;  %s1966_s18 = sld [smem:[#allocation4 + $0xa]] }
  0x63   :  { %v424_v17 = vxor.u32 2147483648, %v423_v46  ;;  %v1673_v24 = vand.u32 3, %v536_v5  ;;  %vm434_vm15 = vcmp.lt.s32.totalorder %v1656_v14, 2  ;;  %vm435_vm0 = vcmp.eq.s32.totalorder %v1656_v14, 0 }
  0x64   :  { %vm438_vm1 = vcmp.eq.s32.totalorder %v1656_v14, 2  ;;  %v1780_v5 = vstv %s1677_s16  ;;  %s1959_s16 = sld [smem:[#allocation4 + $0x8]] }
  0x65   :  { %v425_v63 = vsel %vm342_vm6, %v424_v17, %v423_v46  ;;  %vm539_vm2 = vcmp.eq.s32.totalorder %v1673_v24, 0  ;;  %vm542_vm3 = vcmp.eq.s32.totalorder %v1673_v24, 2  ;;  %vm538_vm6 = vcmp.lt.s32.totalorder %v1673_v24, 2 }
  0x66   :  { %v1330_v41 = vpop.eup %1329  ;;  %v428_v9 = vsel %vm341_vm14, %v1417_v3, %v425_v63 }
  0x67   :  { %v1332_v44 = vpop.eup %1331  ;;  %v177_v45 = vxor.u32 2147483648, %v1330_v41  ;;  %1333 = vcosq.f32 %v428_v9 }
  0x68   :  { %v174_v29 = vxor.u32 2147483648, %v1332_v44  ;;  %1335 = vsinq.f32 %v428_v9  ;;  %v1794_v9 = vstv %s1679_s17  ;;  %s1964_s17 = sld [smem:[#allocation4 + $0x9]] }
  0x69   :  { %v178_v32 = vsel %vm176_vm8, %v177_v45, %v1332_v44  ;;  %v282_v47 = vsel %vm280_vm9, %v177_v45, %v1332_v44 }
  0x6a   :  { %v175_v52 = vsel %vm173_vm10, %v1330_v41, %v174_v29  ;;  %v279_v30 = vsel %vm277_vm11, %v1330_v41, %v174_v29 }
  0x6b   :  { %v179_v58 = vsel %vm172_vm12, %v175_v52, %v178_v32  ;;  %v283_v59 = vsel %vm276_vm13, %v279_v30, %v282_v47  ;;  %v683_v32 = vsub.s32 0, %v1675_v25  ;;  %v1734_v52 = vstv %s1646_s10  ;;  %s1860_s10 = sld [smem:[#allocation4 + $0x2]] }
  0x6c   :  { %v180_v62 = vsel %vm170_vm5, nan, %v179_v58  ;;  %v284_v54 = vsel %vm170_vm5, nan, %v283_v59  ;;  %v1737_v30 = vstv %s1651_s11  ;;  %v1748_v58 = vstv %s1663_s14  ;;  %s1889_s11 = sld [smem:[#allocation4 + $0x3]]  ;;  %s1949_s14 = sld [smem:[#allocation4 + $0x6]] }
  0x6d   :  { %v285_v4 = vsub.f32 1.0, %v180_v62  ;;  %v289_v48 = vmul.f32 %v1592_v34, %v284_v54  ;;  %v291_v7 = vmul.f32 %v1598_v35, %v284_v54  ;;  %v287_v13 = vmul.f32 %v1589_v33, %v284_v54  ;;  %v1769_v54 = vld [vmem:[%s2356_s2 + $0x3] sm:$0x1] }
  0x6e   :  { %vm432_vm5 = vweird.f32 %v1417_v3  ;;  %vm709_vm12 = vweird.f32 %v1448_v57 }
  0x6f   :  { %v292_v10 = vmul.f32 %v1589_v33, %v285_v4  ;;  %v293_v11 = vmul.f32 %v1592_v34, %v285_v4  ;;  %v294_v12 = vmul.f32 %v1598_v35, %v285_v4  ;;  %v1291_v4 = vmin.u32 %v683_v32, %v1675_v25 }
  0x70   :  { %v1845_v32 = vstv %s1739_s22 }
  0x71   :  { %v295_v49 = vmul.f32 %v293_v11, %v1589_v33  ;;  %v296_v53 = vmul.f32 %v294_v12, %v1592_v34  ;;  %v297_v18 = vmul.f32 %v292_v10, %v1598_v35  ;;  %v298_v20 = vmul.f32 %v292_v10, %v1589_v33 }
  0x72   :  { %v303_v23 = vmul.f32 %v293_v11, %v1592_v34  ;;  %v308_v55 = vmul.f32 %v294_v12, %v1598_v35  ;;  %v1082_v10 = vstv %s1691_s19  ;;  %v1805_v11 = vld [vmem:[%s2356_s2 + $0x5] sm:$0x1]  ;;  %s1973_s19 = sld [smem:[#allocation4 + $0xb]] }
  0x73   :  { %v1681_v27 = vadd.f32 %v298_v20, %v180_v62  ;;  %v1683_v16 = vsub.f32 %v295_v49, %v291_v7  ;;  %v1685_v28 = vadd.f32 %v297_v18, %v289_v48  ;;  %v1687_v31 = vadd.f32 %v295_v49, %v291_v7 }
  0x74   :  { %v1693_v33 = vadd.f32 %v303_v23, %v180_v62  ;;  %v1695_v34 = vsub.f32 %v296_v53, %v287_v13  ;;  %v1697_v35 = vsub.f32 %v297_v18, %v289_v48  ;;  %v1699_v36 = vadd.f32 %v296_v53, %v287_v13  ;;  %v1789_v48 = vld [vmem:[%s2356_s2 + $0x4] sm:$0x1]  ;;  %s1836_s2 = sld [smem:[#allocation4 + $0x1]] }
  0x75   :  { %v1705_v37 = vadd.f32 %v308_v55, %v180_v62  ;;  %v311_v38 = vmul.f32 %v1606_v19, %v1681_v27  ;;  %v314_v40 = vmul.f32 %v1609_v39, %v1683_v16  ;;  %v317_v21 = vmul.f32 %v1613_v42, %v1685_v28 }
  0x76   :  { %v319_v41 = vmul.f32 %v1606_v19, %v1687_v31  ;;  %v321_v43 = vmul.f32 %v1609_v39, %v1693_v33  ;;  %v323_v44 = vmul.f32 %v1613_v42, %v1695_v34  ;;  %v325_v45 = vmul.f32 %v1606_v19, %v1697_v35  ;;  %v1743_v19 = vpop.eup %1333 }
  0x77   :  { %v315_v26 = vadd.f32 %v314_v40, %v311_v38  ;;  %v327_v29 = vmul.f32 %v1609_v39, %v1699_v36  ;;  %v329_v46 = vmul.f32 %v1613_v42, %v1705_v37  ;;  %v1751_v42 = vstv %s1661_s13  ;;  %v1757_v59 = vpop.eup %1335  ;;  %s1935_s13 = sld [smem:[#allocation4 + $0x5]] }
  0x78   :  { %v322_v47 = vadd.f32 %v321_v43, %v319_v41  ;;  %v1811_v13 = vstv %s1669_s15  ;;  %v1814_v49 = vstv %s1701_s20  ;;  %v1084_v53 = vstv %s1703_s0  ;;  %s1957_s15 = sld [smem:[#allocation4 + $0x7]] }
  0x79   :  { %v1745_v17 = vadd.f32 %v317_v21, %v315_v26  ;;  %v328_v39 = vadd.f32 %v327_v29, %v325_v45  ;;  %v436_v20 = vxor.u32 2147483648, %v1757_v59  ;;  %v439_v23 = vxor.u32 2147483648, %v1743_v19 }
  0x7a   :  { %v1759_v62 = vadd.f32 %v323_v44, %v322_v47  ;;  %v1821_v55 = vstv %s1713_s1  ;;  %v685_v38 = vclz %v1291_v4  ;;  %v1824_v40 = vmul.f32 %v1080_v0, %v1769_v54 }
  0x7b   :  { %v1771_v63 = vadd.f32 %v329_v46, %v328_v39  ;;  %v331_v2 = vmul.f32 %v1745_v17, %v1745_v17  ;;  %v1827_v21 = vmul.f32 %v1082_v10, %v1789_v48  ;;  %v673_v44 = vadd.s32 %v1556_v8, %v1579_v22 }
  0x7c   :  { %v332_v7 = vmul.f32 %v1759_v62, %v1759_v62  ;;  %2370 = vst [vmem:[#allocation8_spill] sm:$0xff] %v1824_v40  ;;  %v703_v45 = vsub.s32 4, %v1623_v56  ;;  %v1834_v26 = vmul.f32 %v1084_v53, %v1805_v11  ;;  %v1292_v46 = vadd.s32 4294967294, %v685_v38 }
  0x7d   :  { %v334_v12 = vmul.f32 %v1771_v63, %v1771_v63  ;;  %2371 = vst [vmem:[#allocation9_spill] sm:$0xff] %v1827_v21  ;;  %v1848_v8 = vstv %s1741_s23  ;;  %v1851_v22 = vstv %s1753_s24  ;;  %v437_v47 = vsel %vm435_vm0, %v1743_v19, %v436_v20 }
  0x7e   :  { %v333_v18 = vadd.f32 %v332_v7, %v331_v2  ;;  %2372 = vst [vmem:[#allocation10_spill] sm:$0xff] %v1834_v26  ;;  %v440_v61 = vsel %vm438_vm1, %v439_v23, %v1757_v59  ;;  %vm1293_vm8 = vcmp.lt.s32.totalorder %v1292_v46, 0  ;;  %v1863_v2 = vstv %s1755_s25 }
  0x7f   :  { %2375 = vst [vmem:[#allocation11_spill] sm:$0xff] %v1863_v2  ;;  %v1866_v4 = vstv %s1782_s29  ;;  %v1869_v7 = vstv %s1784_s30  ;;  %v688_v0 = vsel %vm1293_vm8, 0, %v1292_v46  ;;  %v704_v10 = vsel %vm619_vm4, %v703_v45, %v1623_v56 }
  0x80   :  { %v335_v43 = vadd.f32 %v334_v12, %v333_v18  ;;  %2376 = vst [vmem:[#allocation12_spill] sm:$0xff] %v1866_v4  ;;  %2377 = vst [vmem:[#allocation13_spill] sm:$0xff] %v1869_v7  ;;  %v1117_v53 = vstv %s1800_s7  ;;  %v441_v18 = vsel %vm434_vm15, %v437_v47, %v440_v61  ;;  %v689_v38 = vsub.s32 32, %v688_v0 }
  0x81   :  { %v693_v39 = vsub.s32 4294967266, %v688_v0  ;;  %v541_v41 = vsel %vm539_vm2, %v1743_v19, %v436_v20  ;;  %v544_v46 = vsel %vm542_vm3, %v439_v23, %v1757_v59  ;;  %v570_v56 = vmul.f32 %v1621_v51, %v1681_v27 }
  0x82   :  { %1337 = vrsqrt.f32 %v335_v43  ;;  %v690_v43 = vshll.u32 %v1675_v25, %v688_v0  ;;  %v573_v14 = vmul.f32 %v1628_v60, %v1683_v16  ;;  %v578_v25 = vmul.f32 %v1621_v51, %v1687_v31 }
  0x83   :  { %v580_v45 = vmul.f32 %v1628_v60, %v1693_v33  ;;  %v691_v19 = vshrl.u32 %v673_v44, %v689_v38  ;;  %v694_v20 = vadd.s32 127, %v693_v39  ;;  %v442_v59 = vsel %vm432_vm5, nan, %v441_v18 }
  0x84   :  { %v584_v23 = vmul.f32 %v1621_v51, %v1697_v35  ;;  %v586_v47 = vmul.f32 %v1628_v60, %v1699_v36  ;;  %v1120_v61 = vstv %s1836_s2  ;;  %v545_v0 = vsel %vm538_vm6, %v541_v41, %v544_v46 }
  0x85   :  { %v692_v12 = vor.u32 %v691_v19, %v690_v43  ;;  %v695_v7 = vshll.u32 %v694_v20, 23  ;;  %v1905_v26 = vmul.f32 %v1117_v53, %v1769_v54  ;;  %v576_v44 = vmul.f32 %v1637_v1, %v1685_v28 }
  0x86   :  { %v582_v39 = vmul.f32 %v1637_v1, %v1695_v34  ;;  %v1913_v51 = vsel %vm1840_vm7, 0, %v704_v10  ;;  %v1123_v60 = vstv %s1860_s10  ;;  %v547_v18 = vsub.f32 1.0, %v442_v59 }
  0x87   :  { %2378 = vst [vmem:[#allocation14_spill] sm:$0xff] %v1905_v26  ;;  %v574_v24 = vadd.f32 %v573_v14, %v570_v56  ;;  %v581_v41 = vadd.f32 %v580_v45, %v578_v25  ;;  %v696_v38 = vor.u32 4788187, %v695_v7  ;;  %v546_v53 = vsel %vm432_vm5, nan, %v545_v0 }
  0x88   :  { %v587_v46 = vadd.f32 %v586_v47, %v584_v23  ;;  %v588_v19 = vmul.f32 %v1637_v1, %v1705_v37  ;;  %v699_v20 = vcvt.s32.f32 %v692_v12  ;;  %v1924_v56 = vand.u32 3, %v1913_v51 }
  0x89   :  { %v697_v2 = vand.u32 2147483647, %v696_v38  ;;  %v1927_v7 = vmul.f32 %v1120_v61, %v1789_v48  ;;  %v1930_v3 = vmul.f32 %v1123_v60, %v1805_v11  ;;  %v1147_v14 = vstv %s1889_s11 }
  0x8a   :  { %v577_v45 = vadd.f32 %v576_v44, %v574_v24  ;;  %v583_v38 = vadd.f32 %v582_v39, %v581_v41  ;;  %vm715_vm9 = vcmp.eq.s32.totalorder %v1924_v56, 2  ;;  %vm712_vm10 = vcmp.eq.s32.totalorder %v1924_v56, 0 }
  0x8b   :  { %2379 = vst [vmem:[#allocation15_spill] sm:$0xff] %v1927_v7  ;;  %2380 = vst [vmem:[#allocation16_spill] sm:$0xff] %v1930_v3  ;;  %v700_v47 = vmul.f32 %v699_v20, %v697_v2  ;;  %vm711_vm11 = vcmp.lt.s32.totalorder %v1924_v56, 2 }
  0x8c   :  { %v1338_v43 = vpop.eup %1337 }
  0x8d   :  { %v337_v26 = vmul.f32 %v1338_v43, %v1745_v17  ;;  %v338_v10 = vmul.f32 %v1338_v43, %v1759_v62  ;;  %v339_v4 = vmul.f32 %v1338_v43, %v1771_v63  ;;  %v589_v43 = vadd.f32 %v588_v19, %v587_v46 }
  0x8f   :  { %v548_v25 = vmul.f32 %v546_v53, %v337_v26  ;;  %v549_v1 = vmul.f32 %v546_v53, %v338_v10  ;;  %v551_v12 = vmul.f32 %v547_v18, %v337_v26  ;;  %v550_v17 = vmul.f32 %v546_v53, %v339_v4 }
  0x90   :  { %v552_v23 = vmul.f32 %v547_v18, %v338_v10  ;;  %v553_v62 = vmul.f32 %v547_v18, %v339_v4  ;;  %v701_v18 = vxor.u32 2147483648, %v700_v47 }
  0x91   :  { %v556_v63 = vmul.f32 %v551_v12, %v339_v4  ;;  %v557_v0 = vmul.f32 %v551_v12, %v337_v26 }
  0x92   :  { %v554_v61 = vmul.f32 %v552_v23, %v337_v26  ;;  %v555_v7 = vmul.f32 %v553_v62, %v338_v10  ;;  %v562_v21 = vmul.f32 %v552_v23, %v338_v10  ;;  %v567_v60 = vmul.f32 %v553_v62, %v339_v4 }
  0x93   :  { %v1937_v3 = vadd.f32 %v557_v0, %v442_v59  ;;  %v1939_v40 = vadd.f32 %v556_v63, %v549_v1  ;;  %v1941_v44 = vsub.f32 %v556_v63, %v549_v1  ;;  %v702_v1 = vsel %vm619_vm4, %v701_v18, %v700_v47 }
  0x94   :  { %v559_v2 = vsub.f32 %v554_v61, %v550_v17  ;;  %v1943_v24 = vadd.f32 %v554_v61, %v550_v17  ;;  %v1945_v39 = vadd.f32 %v562_v21, %v442_v59  ;;  %v1947_v41 = vsub.f32 %v555_v7, %v548_v25 }
  0x95   :  { %v1951_v26 = vadd.f32 %v555_v7, %v548_v25  ;;  %v1953_v4 = vadd.f32 %v567_v60, %v442_v59  ;;  %v590_v53 = vmul.f32 %v577_v45, %v1937_v3  ;;  %v594_v46 = vmul.f32 %v589_v43, %v1939_v40 }
  0x96   :  { %v592_v19 = vmul.f32 %v583_v38, %v559_v2  ;;  %v596_v21 = vmul.f32 %v577_v45, %v1943_v24  ;;  %v598_v20 = vmul.f32 %v583_v38, %v1945_v39  ;;  %v600_v10 = vmul.f32 %v589_v43, %v1947_v41 }
  0x97   :  { %v602_v59 = vmul.f32 %v577_v45, %v1941_v44  ;;  %v604_v7 = vmul.f32 %v583_v38, %v1951_v26  ;;  %v606_v25 = vmul.f32 %v589_v43, %v1953_v4  ;;  %v705_v23 = vsel %vm1840_vm7, %v1448_v57, %v702_v1 }
  0x98   :  { %v593_v12 = vadd.f32 %v592_v19, %v590_v53  ;;  %v599_v17 = vadd.f32 %v598_v20, %v596_v21  ;;  %v813_v62 = vadd.s32 3, %v1913_v51  ;;  %1339 = vcosq.f32 %v705_v23 }
  0x99   :  { %v605_v63 = vadd.f32 %v604_v7, %v602_v59  ;;  %v1980_v45 = vmul.f32 %v1147_v14, %v1769_v54  ;;  %v1150_v0 = vstv %s1933_s12  ;;  %1341 = vsinq.f32 %v705_v23 }
  0x9a   :  { %v1983_v38 = vadd.f32 %v594_v46, %v593_v12  ;;  %v1985_v47 = vadd.f32 %v600_v10, %v599_v17  ;;  %v1153_v43 = vstv %s1935_s13  ;;  %v846_v29 = vmul.f32 %v1937_v3, %v1681_v27 }
  0x9b   :  { %v1988_v61 = vadd.f32 %v606_v25, %v605_v63  ;;  %v848_v51 = vmul.f32 %v559_v2, %v1687_v31  ;;  %v814_v18 = vand.u32 3, %v813_v62  ;;  %v2000_v53 = vmul.f32 %v1150_v0, %v1789_v48 }
  0x9c   :  { %v608_v14 = vmul.f32 %v1983_v38, %v1983_v38  ;;  %v609_v60 = vmul.f32 %v1985_v47, %v1985_v47  ;;  %v2006_v19 = vmul.f32 %v1153_v43, %v1805_v11  ;;  %v1177_v21 = vstv %s1949_s14 }
  0x9d   :  { %v611_v46 = vmul.f32 %v1988_v61, %v1988_v61  ;;  %v1180_v20 = vstv %s1957_s15  ;;  %v1183_v59 = vstv %s1959_s16  ;;  %v1207_v7 = vstv %s1964_s17 }
  0x9e   :  { %v610_v10 = vadd.f32 %v609_v60, %v608_v14  ;;  %v1210_v25 = vstv %s1966_s18  ;;  %v849_v1 = vadd.f32 %v848_v51, %v846_v29  ;;  %v850_v12 = vmul.f32 %v1939_v40, %v1697_v35 }
  0x9f   :  { %v852_v17 = vmul.f32 %v1937_v3, %v1683_v16  ;;  %v1213_v23 = vstv %s1973_s19  ;;  %v854_v63 = vmul.f32 %v559_v2, %v1693_v33  ;;  %v858_v0 = vmul.f32 %v1937_v3, %v1685_v28 }
  0xa0   :  { %v612_v62 = vadd.f32 %v611_v46, %v610_v10  ;;  %v860_v43 = vmul.f32 %v559_v2, %v1695_v34  ;;  %vm815_vm13 = vcmp.lt.s32.totalorder %v814_v18, 2  ;;  %vm816_vm14 = vcmp.eq.s32.totalorder %v814_v18, 0 }
  0xa1   :  { %vm819_vm15 = vcmp.eq.s32.totalorder %v814_v18, 2  ;;  %v2024_v29 = vmul.f32 %v1177_v21, %v1769_v54  ;;  %v2027_v51 = vmul.f32 %v1180_v20, %v1789_v48  ;;  %v2030_v14 = vmul.f32 %v1183_v59, %v1805_v11 }
  0xa2   :  { %1343 = vrsqrt.f32 %v612_v62  ;;  %v2033_v60 = vmul.f32 %v1207_v7, %v1769_v54  ;;  %v1340_v46 = vpop.eup %1339  ;;  %v2035_v3 = vadd.f32 %v850_v12, %v849_v1  ;;  %v856_v2 = vmul.f32 %v1939_v40, %v1699_v36 }
  0xa3   :  { %2381 = vst [vmem:[#allocation17_spill] sm:$0xff] %v2027_v51  ;;  %v2040_v10 = vmul.f32 %v1210_v25, %v1789_v48  ;;  %v2043_v21 = vmul.f32 %v1213_v23, %v1805_v11  ;;  %v1342_v20 = vpop.eup %1341  ;;  %v716_v62 = vxor.u32 2147483648, %v1340_v46  ;;  %v855_v51 = vadd.f32 %v854_v63, %v852_v17 }
  0xa4   :  { %v861_v59 = vadd.f32 %v860_v43, %v858_v0  ;;  %v862_v54 = vmul.f32 %v1939_v40, %v1705_v37  ;;  %v713_v7 = vxor.u32 2147483648, %v1342_v20  ;;  %v864_v1 = vmul.f32 %v1943_v24, %v1681_v27 }
  0xa5   :  { %2382 = vst [vmem:[#allocation18_spill] sm:$0xff] %v2040_v10  ;;  %2383 = vst [vmem:[#allocation19_spill] sm:$0xff] %v2043_v21  ;;  %v866_v12 = vmul.f32 %v1945_v39, %v1687_v31  ;;  %v870_v48 = vmul.f32 %v1943_v24, %v1683_v16  ;;  %v717_v11 = vsel %vm715_vm9, %v716_v62, %v1342_v20 }
  0xa6   :  { %v872_v25 = vmul.f32 %v1945_v39, %v1693_v33  ;;  %v876_v17 = vmul.f32 %v1943_v24, %v1685_v28  ;;  %v878_v40 = vmul.f32 %v1945_v39, %v1695_v34  ;;  %v714_v23 = vsel %vm712_vm10, %v1340_v46, %v713_v7 }
  0xa7   :  { %v818_v63 = vsel %vm816_vm14, %v1340_v46, %v713_v7  ;;  %v821_v0 = vsel %vm819_vm15, %v716_v62, %v1342_v20  ;;  %v882_v43 = vmul.f32 %v1941_v44, %v1681_v27  ;;  %v718_v21 = vsel %vm711_vm11, %v714_v23, %v717_v11 }
  0xa8   :  { %v884_v10 = vmul.f32 %v1951_v26, %v1687_v31  ;;  %v888_v24 = vmul.f32 %v1941_v44, %v1683_v16  ;;  %v890_v39 = vmul.f32 %v1951_v26, %v1693_v33  ;;  %v719_v46 = vsel %vm709_vm12, nan, %v718_v21 }
  0xa9   :  { %v867_v7 = vadd.f32 %v866_v12, %v864_v1  ;;  %v868_v20 = vmul.f32 %v1947_v41, %v1697_v35  ;;  %v874_v27 = vmul.f32 %v1947_v41, %v1699_v36  ;;  %v822_v56 = vsel %vm815_vm13, %v818_v63, %v821_v0 }
  0xaa   :  { %v873_v62 = vadd.f32 %v872_v25, %v870_v48  ;;  %v879_v31 = vadd.f32 %v878_v40, %v876_v17  ;;  %v880_v16 = vmul.f32 %v1947_v41, %v1705_v37  ;;  %v824_v11 = vsub.f32 1.0, %v719_v46 }
  0xab   :  { %v2084_v23 = vadd.f32 %v856_v2, %v855_v51  ;;  %v894_v33 = vmul.f32 %v1941_v44, %v1685_v28  ;;  %v896_v21 = vmul.f32 %v1951_v26, %v1695_v34  ;;  %v885_v12 = vadd.f32 %v884_v10, %v882_v43 }
  0xac   :  { %v1344_v1 = vpop.eup %1343  ;;  %v886_v18 = vmul.f32 %v1953_v4, %v1697_v35  ;;  %v891_v63 = vadd.f32 %v890_v39, %v888_v24  ;;  %v892_v48 = vmul.f32 %v1953_v4, %v1699_v36  ;;  %v823_v28 = vsel %vm709_vm12, nan, %v822_v56 }
  0xad   :  { %v614_v41 = vmul.f32 %v1344_v1, %v1983_v38  ;;  %v615_v51 = vmul.f32 %v1344_v1, %v1985_v47  ;;  %v616_v2 = vmul.f32 %v1344_v1, %v1988_v61  ;;  %v2099_v44 = vadd.f32 %v862_v54, %v861_v59 }
  0xae   :  { %v869_v34 = vadd.f32 %v868_v20, %v867_v7  ;;  %v875_v26 = vadd.f32 %v874_v27, %v873_v62  ;;  %v2101_v10 = vadd.f32 %v880_v16, %v879_v31  ;;  %v897_v17 = vadd.f32 %v896_v21, %v894_v33 }
  0xaf   :  { %v826_v35 = vmul.f32 %v823_v28, %v615_v51  ;;  %v828_v25 = vmul.f32 %v824_v11, %v614_v41  ;;  %v898_v36 = vmul.f32 %v1953_v4, %v1705_v37  ;;  %v825_v38 = vmul.f32 %v823_v28, %v614_v41 }
  0xb0   :  { %v827_v40 = vmul.f32 %v823_v28, %v616_v2  ;;  %v829_v47 = vmul.f32 %v824_v11, %v615_v51  ;;  %v830_v0 = vmul.f32 %v824_v11, %v616_v2  ;;  %v887_v57 = vadd.f32 %v886_v18, %v885_v12 }
  0xb1   :  { %v833_v61 = vmul.f32 %v828_v25, %v616_v2  ;;  %v834_v43 = vmul.f32 %v828_v25, %v614_v41  ;;  %v893_v24 = vadd.f32 %v892_v48, %v891_v63  ;;  %v899_v62 = vadd.f32 %v898_v36, %v897_v17 }
  0xb2   :  { %v831_v59 = vmul.f32 %v829_v47, %v614_v41  ;;  %v832_v54 = vmul.f32 %v830_v0, %v615_v51  ;;  %v839_v39 = vmul.f32 %v829_v47, %v615_v51  ;;  %v844_v7 = vmul.f32 %v830_v0, %v616_v2 }
  0xb3   :  { %v835_v20 = vadd.f32 %v834_v43, %v719_v46  ;;  %v837_v27 = vadd.f32 %v833_v61, %v826_v35  ;;  %v842_v56 = vsub.f32 %v833_v61, %v826_v35 }
  0xb4   :  { %v836_v31 = vsub.f32 %v831_v59, %v827_v40  ;;  %v838_v16 = vadd.f32 %v831_v59, %v827_v40  ;;  %v840_v33 = vadd.f32 %v839_v39, %v719_v46  ;;  %v841_v37 = vsub.f32 %v832_v54, %v825_v38 }
  0xb5   :  { %v843_v4 = vadd.f32 %v832_v54, %v825_v38  ;;  %v845_v21 = vadd.f32 %v844_v7, %v719_v46  ;;  %v900_v11 = vmul.f32 %v2035_v3, %v835_v20  ;;  %v904_v1 = vmul.f32 %v887_v57, %v837_v27 }
  0xb6   :  { %v902_v28 = vmul.f32 %v869_v34, %v836_v31  ;;  %v906_v12 = vmul.f32 %v2084_v23, %v835_v20  ;;  %v908_v18 = vmul.f32 %v875_v26, %v836_v31  ;;  %v910_v63 = vmul.f32 %v893_v24, %v837_v27 }
  0xb7   :  { %v912_v48 = vmul.f32 %v2099_v44, %v835_v20  ;;  %v914_v41 = vmul.f32 %v2101_v10, %v836_v31  ;;  %v916_v51 = vmul.f32 %v899_v62, %v837_v27  ;;  %v918_v2 = vmul.f32 %v2035_v3, %v838_v16 }
  0xb8   :  { %v903_v35 = vadd.f32 %v902_v28, %v900_v11  ;;  %v909_v25 = vadd.f32 %v908_v18, %v906_v12  ;;  %v920_v17 = vmul.f32 %v869_v34, %v840_v33  ;;  %v922_v36 = vmul.f32 %v887_v57, %v841_v37 }
  0xb9   :  { %v915_v46 = vadd.f32 %v914_v41, %v912_v48  ;;  %v924_v38 = vmul.f32 %v2084_v23, %v838_v16  ;;  %v926_v40 = vmul.f32 %v875_v26, %v840_v33  ;;  %v928_v47 = vmul.f32 %v893_v24, %v841_v37 }
  0xba   :  { %v905_v0 = vadd.f32 %v904_v1, %v903_v35  ;;  %v911_v61 = vadd.f32 %v910_v63, %v909_v25  ;;  %v921_v43 = vadd.f32 %v920_v17, %v918_v2  ;;  %v930_v59 = vmul.f32 %v2099_v44, %v838_v16 }
  0xbb   :  { %v917_v54 = vadd.f32 %v916_v51, %v915_v46  ;;  %v927_v39 = vadd.f32 %v926_v40, %v924_v38  ;;  %v932_v7 = vmul.f32 %v2101_v10, %v840_v33  ;;  %v934_v20 = vmul.f32 %v899_v62, %v841_v37 }
  0xbc   :  { %v923_v27 = vadd.f32 %v922_v36, %v921_v43  ;;  %v936_v31 = vmul.f32 %v2035_v3, %v842_v56  ;;  %v938_v11 = vmul.f32 %v869_v34, %v843_v4  ;;  %v940_v28 = vmul.f32 %v887_v57, %v845_v21 }
  0xbd   :  { %v929_v12 = vadd.f32 %v928_v47, %v927_v39  ;;  %v933_v18 = vadd.f32 %v932_v7, %v930_v59  ;;  %v942_v48 = vmul.f32 %v2084_v23, %v842_v56  ;;  %v944_v41 = vmul.f32 %v875_v26, %v843_v4 }
  0xbe   :  { %v939_v1 = vadd.f32 %v938_v11, %v936_v31  ;;  %v946_v63 = vmul.f32 %v893_v24, %v845_v21  ;;  %v948_v2 = vmul.f32 %v2099_v44, %v842_v56  ;;  %v950_v16 = vmul.f32 %v2101_v10, %v843_v4 }
  0xbf   :  { %v935_v51 = vadd.f32 %v934_v20, %v933_v18  ;;  %v945_v35 = vadd.f32 %v944_v41, %v942_v48  ;;  %v952_v33 = vmul.f32 %v899_v62, %v845_v21  ;;  %v955_v37 = vmul.f32 %v1640_v6, %v905_v0 }
  0xc0   :  { %v941_v25 = vadd.f32 %v940_v28, %v939_v1  ;;  %v951_v3 = vadd.f32 %v950_v16, %v948_v2  ;;  %v958_v34 = vmul.f32 %v1659_v15, %v911_v61  ;;  %v961_v57 = vmul.f32 %v1731_v50, %v917_v54 }
  0xc1   :  { %v947_v17 = vadd.f32 %v946_v63, %v945_v35  ;;  %v964_v23 = vmul.f32 %v1734_v52, %v905_v0  ;;  %v967_v26 = vmul.f32 %v1737_v30, %v911_v61  ;;  %v970_v44 = vmul.f32 %v1748_v58, %v917_v54 }
  0xc2   :  { %v953_v24 = vadd.f32 %v952_v33, %v951_v3  ;;  %v959_v10 = vadd.f32 %v958_v34, %v955_v37  ;;  %v973_v56 = vmul.f32 %v1751_v42, %v905_v0  ;;  %v976_v62 = vmul.f32 %v1780_v5, %v911_v61 }
  0xc3   :  { %v968_v4 = vadd.f32 %v967_v26, %v964_v23  ;;  %v979_v21 = vmul.f32 %v1794_v9, %v917_v54  ;;  %v981_v36 = vmul.f32 %v1640_v6, %v923_v27  ;;  %v983_v46 = vmul.f32 %v1659_v15, %v929_v12 }
  0xc4   :  { %v962_v38 = vadd.f32 %v961_v57, %v959_v10  ;;  %v977_v40 = vadd.f32 %v976_v62, %v973_v56  ;;  %v985_v47 = vmul.f32 %v1731_v50, %v935_v51  ;;  %v987_v43 = vmul.f32 %v1734_v52, %v923_v27 }
  0xc5   :  { %v2130_v59 = vadd.f32 %v970_v44, %v968_v4  ;;  %v984_v39 = vadd.f32 %v983_v46, %v981_v36  ;;  %v989_v0 = vmul.f32 %v1737_v30, %v929_v12  ;;  %v991_v61 = vmul.f32 %v1748_v58, %v935_v51  ;;  %v2384_v36 = vld [vmem:[#allocation8_spill] sm:$0xff] }
  0xc6   :  { %v2134_v7 = vadd.f32 %v979_v21, %v977_v40  ;;  %v993_v54 = vmul.f32 %v1751_v42, %v923_v27  ;;  %v995_v20 = vmul.f32 %v1780_v5, %v929_v12  ;;  %v997_v31 = vmul.f32 %v1794_v9, %v935_v51 }
  0xc7   :  { %v986_v11 = vadd.f32 %v985_v47, %v984_v39  ;;  %v990_v28 = vadd.f32 %v989_v0, %v987_v43  ;;  %v999_v18 = vmul.f32 %v1640_v6, %v941_v25  ;;  %v1001_v48 = vmul.f32 %v1659_v15, %v947_v17  ;;  %v2385_v0 = vld [vmem:[#allocation9_spill] sm:$0xff] }
  0xc8   :  { %v996_v41 = vadd.f32 %v995_v20, %v993_v54  ;;  %v1003_v1 = vmul.f32 %v1731_v50, %v953_v24  ;;  %v1005_v63 = vmul.f32 %v1734_v52, %v941_v25  ;;  %v1007_v2 = vmul.f32 %v1737_v30, %v947_v17 }
  0xc9   :  { %v992_v16 = vadd.f32 %v991_v61, %v990_v28  ;;  %v1002_v35 = vadd.f32 %v1001_v48, %v999_v18  ;;  %v1009_v27 = vmul.f32 %v1748_v58, %v953_v24  ;;  %v1011_v12 = vmul.f32 %v1751_v42, %v941_v25  ;;  %v2386_v28 = vld [vmem:[#allocation11_spill] sm:$0xff]  ;;  %v2387_v48 = vld [vmem:[#allocation12_spill] sm:$0xff] }
  0xca   :  { %v998_v51 = vadd.f32 %v997_v31, %v996_v41  ;;  %v1008_v33 = vadd.f32 %v1007_v2, %v1005_v63  ;;  %v1013_v37 = vmul.f32 %v1780_v5, %v947_v17  ;;  %v1015_v6 = vmul.f32 %v1794_v9, %v953_v24 }
  0xcb   :  { %v1004_v15 = vadd.f32 %v1003_v1, %v1002_v35  ;;  %v1018_v3 = vmul.f32 %v1811_v13, %v962_v38  ;;  %v1021_v50 = vmul.f32 %v1814_v49, %v986_v11  ;;  %v1026_v52 = vmul.f32 %v1811_v13, %v2130_v59 }
  0xcc   :  { %v1010_v30 = vadd.f32 %v1009_v27, %v1008_v33  ;;  %v1014_v34 = vadd.f32 %v1013_v37, %v1011_v12  ;;  %v1028_v58 = vmul.f32 %v1814_v49, %v992_v16  ;;  %v1032_v42 = vmul.f32 %v1811_v13, %v2134_v7  ;;  %v2389_v12 = vld [vmem:[#allocation13_spill] sm:$0xff] }
  0xcd   :  { %v1022_v25 = vadd.f32 %v1021_v50, %v1018_v3  ;;  %v1024_v5 = vmul.f32 %v1821_v55, %v1004_v15  ;;  %v1034_v9 = vmul.f32 %v1814_v49, %v998_v51  ;;  %v1039_v57 = vmul.f32 %v1845_v32, %v962_v38 }
  0xce   :  { %v1016_v17 = vadd.f32 %v1015_v6, %v1014_v34  ;;  %v1029_v23 = vadd.f32 %v1028_v58, %v1026_v52  ;;  %v1030_v26 = vmul.f32 %v1821_v55, %v1010_v30  ;;  %v1042_v44 = vmul.f32 %v1848_v8, %v986_v11 }
  0xcf   :  { %v2160_v24 = vadd.f32 %v1024_v5, %v1022_v25  ;;  %v1035_v10 = vadd.f32 %v1034_v9, %v1032_v42  ;;  %v1045_v56 = vmul.f32 %v1851_v22, %v1004_v15  ;;  %v1047_v13 = vmul.f32 %v1845_v32, %v2130_v59  ;;  %v2391_v5 = vld [vmem:[#allocation14_spill] sm:$0xff] }
  0xd0   :  { %v2165_v62 = vadd.f32 %v1030_v26, %v1029_v23  ;;  %v1036_v49 = vmul.f32 %v1821_v55, %v1016_v17  ;;  %v1043_v4 = vadd.f32 %v1042_v44, %v1039_v57  ;;  %v1049_v21 = vmul.f32 %v1848_v8, %v992_v16  ;;  %v2392_v57 = vld [vmem:[#allocation15_spill] sm:$0xff]  ;;  %v2393_v44 = vld [vmem:[#allocation16_spill] sm:$0xff] }
  0xd1   :  { %v1086_v46 = vmul.f32 %v2384_v36, %v2160_v24  ;;  %v1051_v40 = vmul.f32 %v1851_v22, %v1010_v30  ;;  %v1053_v47 = vmul.f32 %v1845_v32, %v2134_v7  ;;  %v1055_v43 = vmul.f32 %v1848_v8, %v998_v51  ;;  %v2388_v32 = vld [vmem:[#allocation10_spill] sm:$0xff] }
  0xd2   :  { %v2175_v39 = vadd.f32 %v1036_v49, %v1035_v10  ;;  %v1088_v61 = vmul.f32 %v2385_v0, %v2165_v62  ;;  %v2179_v54 = vadd.f32 %v1045_v56, %v1043_v4  ;;  %v1050_v55 = vadd.f32 %v1049_v21, %v1047_v13 }
  0xd3   :  { %v1056_v20 = vadd.f32 %v1055_v43, %v1053_v47  ;;  %v1057_v31 = vmul.f32 %v1851_v22, %v1016_v17  ;;  %v1060_v18 = vmul.f32 %v2386_v28, %v962_v38  ;;  %v1063_v41 = vmul.f32 %v2387_v48, %v986_v11 }
  0xd4   :  { %v1089_v1 = vadd.f32 %v1088_v61, %v1086_v46  ;;  %v1090_v8 = vmul.f32 %v2388_v32, %v2175_v39  ;;  %v2186_v63 = vadd.f32 %v1051_v40, %v1050_v55  ;;  %v1092_v2 = vmul.f32 %v2384_v36, %v2179_v54 }
  0xd5   :  { %v2190_v35 = vadd.f32 %v1057_v31, %v1056_v20  ;;  %v1064_v27 = vadd.f32 %v1063_v41, %v1060_v18  ;;  %v1066_v33 = vmul.f32 %v2389_v12, %v1004_v15  ;;  %v1068_v22 = vmul.f32 %v2386_v28, %v2130_v59 }
  0xd6   :  { %v1091_v38 = vadd.f32 %v1090_v8, %v1089_v1  ;;  %v1094_v11 = vmul.f32 %v2385_v0, %v2186_v63  ;;  %v1070_v37 = vmul.f32 %v2387_v48, %v992_v16  ;;  %v1072_v6 = vmul.f32 %v2389_v12, %v1010_v30 }
  0xd7   :  { %v1096_v3 = vmul.f32 %v2388_v32, %v2190_v35  ;;  %v2201_v50 = vadd.f32 %v1066_v33, %v1064_v27  ;;  %v1074_v52 = vmul.f32 %v2386_v28, %v2134_v7  ;;  %v1076_v15 = vmul.f32 %v2387_v48, %v998_v51 }
  0xd8   :  { %v2390_v34 = vstv %s1723_s21  ;;  %v1095_v58 = vadd.f32 %v1094_v11, %v1092_v2  ;;  %v1071_v42 = vadd.f32 %v1070_v37, %v1068_v22  ;;  %v1078_v16 = vmul.f32 %v2389_v12, %v1016_v17 }
  0xd9   :  { %v2208_v59 = vsub.f32 %v2390_v34, %v1091_v38  ;;  %v1077_v25 = vadd.f32 %v1076_v15, %v1074_v52  ;;  %v1098_v30 = vmul.f32 %v2384_v36, %v2201_v50  ;;  %v1125_v9 = vmul.f32 %v2391_v5, %v2160_v24 }
  0xda   :  { %v1126_v7 = vmul.f32 %v2392_v57, %v2165_v62  ;;  %v1097_v23 = vadd.f32 %v1096_v3, %v1095_v58  ;;  %v2218_v26 = vadd.f32 %v1072_v6, %v1071_v42  ;;  %v1128_v10 = vmul.f32 %v2393_v44, %v2175_v39  ;;  %v2396_v42 = vld [vmem:[#allocation17_spill] sm:$0xff] }
  0xdb   :  { %v1110_v51 = vadd.f32 %v2208_v59, %v1091_v38  ;;  %v2222_v56 = vadd.f32 %v1078_v16, %v1077_v25  ;;  %v1132_v13 = vmul.f32 %v2391_v5, %v2179_v54  ;;  %v1133_v49 = vmul.f32 %v2392_v57, %v2186_v63 }
  0xdc   :  { %v1127_v17 = vadd.f32 %v1126_v7, %v1125_v9  ;;  %v2394_v4 = vstv %s1764_s26  ;;  %v1100_v36 = vmul.f32 %v2385_v0, %v2218_v26  ;;  %v1135_v46 = vmul.f32 %v2393_v44, %v2190_v35 }
  0xdd   :  { %1111 = vst [vmem:[%s2357_s3] sm:$0x1] %v1110_v51  ;;  %v2233_v21 = vsub.f32 %v2394_v4, %v1097_v23  ;;  %v1139_v40 = vmul.f32 %v2391_v5, %v2201_v50  ;;  %v1102_v47 = vmul.f32 %v2388_v32, %v2222_v56  ;;  %v1134_v61 = vadd.f32 %v1133_v49, %v1132_v13 }
  0xde   :  { %v1129_v43 = vadd.f32 %v1128_v10, %v1127_v17  ;;  %v1140_v55 = vmul.f32 %v2392_v57, %v2218_v26  ;;  %v1101_v31 = vadd.f32 %v1100_v36, %v1098_v30  ;;  %v1142_v0 = vmul.f32 %v2393_v44, %v2222_v56 }
  0xdf   :  { %v1112_v20 = vadd.f32 %v2233_v21, %v1097_v23  ;;  %v1155_v28 = vmul.f32 %v1980_v45, %v2160_v24  ;;  %v1136_v48 = vadd.f32 %v1135_v46, %v1134_v61  ;;  %v1156_v1 = vmul.f32 %v2000_v53, %v2165_v62  ;;  %v2398_v61 = vld [vmem:[#allocation19_spill] sm:$0xff] }
  0xe0   :  { %v1130_v18 = vadd.f32 %v1129_v43, %v2208_v59  ;;  %v1141_v41 = vadd.f32 %v1140_v55, %v1139_v40  ;;  %v1103_v32 = vadd.f32 %v1102_v47, %v1101_v31  ;;  %v1158_v8 = vmul.f32 %v2006_v19, %v2175_v39  ;;  %v2397_v40 = vld [vmem:[#allocation18_spill] sm:$0xff] }
  0xe1   :  { %1113 = vst [vmem:[%s2357_s3 + $0x1] sm:$0x1] %v1112_v20  ;;  %v1162_v2 = vmul.f32 %v1980_v45, %v2179_v54  ;;  %v1163_v27 = vmul.f32 %v2000_v53, %v2186_v63  ;;  %v1137_v12 = vadd.f32 %v1136_v48, %v2233_v21  ;;  %v1157_v22 = vadd.f32 %v1156_v1, %v1155_v28 }
  0xe2   :  { %1131 = vst [vmem:[%s2357_s3 + $0x3] sm:$0x1] %v1130_v18  ;;  %v1143_v33 = vadd.f32 %v1142_v0, %v1141_v41  ;;  %v1165_v38 = vmul.f32 %v2006_v19, %v2190_v35  ;;  %v2395_v11 = vstv %s1798_s6  ;;  %v1169_v3 = vmul.f32 %v1980_v45, %v2201_v50 }
  0xe3   :  { %v1109_v37 = vsub.f32 %v2395_v11, %v1103_v32  ;;  %v1164_v6 = vadd.f32 %v1163_v27, %v1162_v2  ;;  %v1170_v52 = vmul.f32 %v2000_v53, %v2218_v26  ;;  %1138 = vst [vmem:[%s2357_s3 + $0x4] sm:$0x1] %v1137_v12  ;;  %v1159_v15 = vadd.f32 %v1158_v8, %v1157_v22 }
  0xe4   :  { %v1172_v34 = vmul.f32 %v2006_v19, %v2222_v56  ;;  %v1185_v58 = vmul.f32 %v2024_v29, %v2160_v24  ;;  %v1186_v16 = vmul.f32 %v2396_v42, %v2165_v62  ;;  %v1188_v57 = vmul.f32 %v2030_v14, %v2175_v39 }
  0xe5   :  { %v1114_v25 = vadd.f32 %v1109_v37, %v1103_v32  ;;  %v1144_v30 = vadd.f32 %v1143_v33, %v1109_v37  ;;  %v1166_v45 = vadd.f32 %v1165_v38, %v1164_v6  ;;  %v1171_v5 = vadd.f32 %v1170_v52, %v1169_v3 }
  0xe6   :  { %v1160_v53 = vadd.f32 %v1159_v15, %v2208_v59  ;;  %v1187_v9 = vadd.f32 %v1186_v16, %v1185_v58  ;;  %v1192_v7 = vmul.f32 %v2024_v29, %v2179_v54  ;;  %v1193_v23 = vmul.f32 %v2396_v42, %v2186_v63 }
  0xe7   :  { %1115 = vst [vmem:[%s2357_s3 + $0x2] sm:$0x1] %v1114_v25  ;;  %1145 = vst [vmem:[%s2357_s3 + $0x5] sm:$0x1] %v1144_v30  ;;  %v1167_v19 = vadd.f32 %v1166_v45, %v2233_v21  ;;  %v1173_v51 = vadd.f32 %v1172_v34, %v1171_v5  ;;  %v1195_v44 = vmul.f32 %v2030_v14, %v2190_v35 }
  0xe8   :  { %1161 = vst [vmem:[%s2357_s3 + $0x6] sm:$0x1] %v1160_v53  ;;  %v1189_v10 = vadd.f32 %v1188_v57, %v1187_v9  ;;  %v1199_v17 = vmul.f32 %v2024_v29, %v2201_v50  ;;  %v1200_v13 = vmul.f32 %v2396_v42, %v2218_v26  ;;  %v1202_v49 = vmul.f32 %v2030_v14, %v2222_v56 }
  0xe9   :  { %1168 = vst [vmem:[%s2357_s3 + $0x7] sm:$0x1] %v1167_v19  ;;  %v1174_v4 = vadd.f32 %v1173_v51, %v1109_v37  ;;  %v1194_v36 = vadd.f32 %v1193_v23, %v1192_v7  ;;  %v1215_v46 = vmul.f32 %v2033_v60, %v2160_v24  ;;  %v1216_v47 = vmul.f32 %v2397_v40, %v2165_v62 }
  0xea   :  { %v1190_v29 = vadd.f32 %v1189_v10, %v2208_v59  ;;  %v1201_v43 = vadd.f32 %v1200_v13, %v1199_v17  ;;  %v1218_v55 = vmul.f32 %v2398_v61, %v2175_v39  ;;  %v1222_v14 = vmul.f32 %v2033_v60, %v2179_v54 }
  0xeb   :  { %1175 = vst [vmem:[%s2357_s3 + $0x8] sm:$0x1] %v1174_v4  ;;  %v1196_v20 = vadd.f32 %v1195_v44, %v1194_v36  ;;  %v1217_v31 = vadd.f32 %v1216_v47, %v1215_v46  ;;  %v1223_v24 = vmul.f32 %v2397_v40, %v2186_v63  ;;  %v1225_v62 = vmul.f32 %v2398_v61, %v2190_v35 }
  0xec   :  { %1191 = vst [vmem:[%s2357_s3 + $0x9] sm:$0x1] %v1190_v29  ;;  %v1203_v39 = vadd.f32 %v1202_v49, %v1201_v43  ;;  %v1229_v54 = vmul.f32 %v2033_v60, %v2201_v50  ;;  %v1230_v0 = vmul.f32 %v2397_v40, %v2218_v26  ;;  %v1232_v28 = vmul.f32 %v2398_v61, %v2222_v56 }
  0xed   :  { %v1197_v18 = vadd.f32 %v1196_v20, %v2233_v21  ;;  %v1219_v63 = vadd.f32 %v1218_v55, %v1217_v31  ;;  %v1224_v48 = vadd.f32 %v1223_v24, %v1222_v14 }
  0xee   :  { %v1204_v41 = vadd.f32 %v1203_v39, %v1109_v37  ;;  %v1231_v35 = vadd.f32 %v1230_v0, %v1229_v54 }
  0xef   :  { %1198 = vst [vmem:[%s2357_s3 + $0xa] sm:$0x1] %v1197_v18  ;;  %v1220_v1 = vadd.f32 %v1219_v63, %v2208_v59  ;;  %v1226_v32 = vadd.f32 %v1225_v62, %v1224_v48 }
  0xf0   :  { %1205 = vst [vmem:[%s2357_s3 + $0xb] sm:$0x1] %v1204_v41  ;;  %v1233_v60 = vadd.f32 %v1232_v28, %v1231_v35 }
  0xf1   :  { %1221 = vst [vmem:[%s2357_s3 + $0xc] sm:$0x1] %v1220_v1  ;;  %v1227_v50 = vadd.f32 %v1226_v32, %v2233_v21 }
  0xf2   :  { %v1234_v26 = vadd.f32 %v1233_v60, %v1109_v37 }
  0xf3   :  { %1228 = vst [vmem:[%s2357_s3 + $0xd] sm:$0x1] %v1227_v50 }
  0xf4   :  { %1235 = vst [vmem:[%s2357_s3 + $0xe] sm:$0x1] %v1234_v26 }
  0xf5   :  { %1240 = vsyncpa [#allocation3], 1 }
  0xf6   :  { %1241 = vsyncpa [#allocation5], 1 }

</bundles_post_ra>
